<compile_context>
chip_gen: v6e
topology: v6e:2x2x1
jax: 0.10.0
libtpu: 0.0.40
codegen_flags: <defaults>
</compile_context>

<pallas_src>
import functools

import jax
import jax.numpy as jnp
import numpy as np
from jax.experimental import pallas as pl
from jax.experimental.pallas import tpu as pltpu


def mha_kernel(xq_ref, xk_ref, xv_ref, mask_ref,
               wq_ref, bq_ref, wk_ref, bk_ref, wv_ref, bv_ref,
               wout_ref, bout_ref, out_ref,
               *, num_heads, d_k, d_v, q_len, k_len, batch_block, compute_dtype):
    H, B = num_heads, batch_block
    G = H * B
    mq = B * q_len                       # query tokens handled this grid step
    mk = B * k_len
    cd = compute_dtype
    f32 = jnp.float32

    # ---- flat lane-dense input projections (one 2-D MXU matmul each) ----------
    # Weights keep the original flat (d_model, H*d) layout so the MXU N-dim is
    # H*d (lane dense).  1/sqrt(d_k) is already folded into wq/bq by the wrapper.
    # f32 accumulation; f32 biases added post-accumulation.
    qp = jnp.dot(xq_ref[...], wq_ref[...], preferred_element_type=f32) + bq_ref[...]
    kp = jnp.dot(xk_ref[...], wk_ref[...], preferred_element_type=f32) + bk_ref[...]
    vp = jnp.dot(xv_ref[...], wv_ref[...], preferred_element_type=f32) + bv_ref[...]

    # ---- split heads: (tokens, H*d) -> (H*B, len, d) ---------------------------
    # Single relayout per projected tensor; no H-fold duplication of activations.
    qg = pltpu.einshape("mhd->hmd", qp.reshape(mq, H, d_k)).reshape(G, q_len, d_k)
    kg = pltpu.einshape("mhd->hmd", kp.reshape(mk, H, d_k)).reshape(G, k_len, d_k)
    vg = pltpu.einshape("mhd->hmd", vp.reshape(mk, H, d_v)).reshape(G, k_len, d_v)

    # ---- (head*batch)-batched scaled dot-product attention ---------------------
    scores = jnp.einsum('gqd,gkd->gqk', qg.astype(cd), kg.astype(cd),
                        preferred_element_type=f32)              # already scaled
    # Mask compare done once at (B, q, k); broadcast over heads via leading axis.
    mask_b = mask_ref[...] != 0                                   # (B, q, k) bool
    scores = jnp.where(mask_b, jnp.float32(-10000.0),
                       scores.reshape(H, B, q_len, k_len)).reshape(G, q_len, k_len)

    # Numerically-stable softmax with normalisation deferred past the PV matmul.
    m = jnp.max(scores, axis=-1, keepdims=True)
    e = jnp.exp(scores - m)
    denom = jnp.sum(e, axis=-1, keepdims=True)                    # (G, q, 1)
    ctx = jnp.einsum('gqk,gkd->gqd', e.astype(cd), vg.astype(cd),
                     preferred_element_type=f32)                  # (G, q, d_v)
    inv = pl.reciprocal(denom, approx=True)
    inv = inv * (2.0 - denom * inv)       # one Newton step -> ~exact f32 reciprocal
    ctx = ctx * inv
    # TODO(synk): dropout (p=0.0 in this config) is the identity and is omitted.

    # ---- output projection: head reduction fused into the MXU ------------------
    # (H*B, q, d_v) -> (tokens, H*d_v); one flat matmul against (H*d_v, d_model) is
    # exactly concat(ctx_heads) @ W_out, with the head sum accumulated on the MXU.
    ctx_flat = pltpu.einshape("hmd->mhd", ctx.reshape(H, mq, d_v)).reshape(mq, H * d_v)
    out = jnp.dot(ctx_flat.astype(cd), wout_ref[...],
                  preferred_element_type=f32) + bout_ref[...]
    out_ref[...] = out.astype(out_ref.dtype)


def _replicated_spec(shape):
    zeros = (0,) * len(shape)
    return pl.BlockSpec(shape, lambda i: zeros)


def _tpu_budget():
    """(vmem_capacity_bytes, tensorcores_per_chip) with conservative fallbacks."""
    vmem_cap = 64 * 1024 * 1024
    num_cores = 1
    try:
        info = pltpu.get_tpu_info()
        vmem_cap = int(getattr(info, "vmem_capacity_bytes", vmem_cap))
        for attr in ("num_cores", "tensorcores_per_chip", "core_count"):
            v = getattr(info, attr, None)
            if v:
                num_cores = int(v)
                break
    except Exception:
        pass
    return vmem_cap, num_cores


def _pick_batch_block(N, q_len, k_len, d_model, num_heads, d_k, d_v,
                      itemsize, vmem_budget, num_cores):
    """Largest divisor of N whose per-step VMEM estimate fits; keeps grid >= num_cores."""
    def est(b):
        mq, mk, G = b * q_len, b * k_len, num_heads * b
        act = 2 * (mq + 2 * mk) * d_model * itemsize               # dbl-buffered x slabs
        outb = 2 * mq * d_model * 4
        msk = 2 * b * max(32, q_len) * max(128, k_len)             # int8 (32,128) tiling
        wts = 2 * (2 * d_model * num_heads * d_k
                   + 2 * d_model * num_heads * d_v) * itemsize     # dbl-buffered weights
        inter = 4 * (2 * G * q_len * k_len                         # scores + exp
                     + G * q_len * d_v                             # ctx
                     + 2 * (mq + 2 * mk) * num_heads * max(d_k, d_v))  # proj + relayout
        return act + outb + msk + wts + inter

    divisors = [b for b in range(1, N + 1) if N % b == 0]
    fitting = [b for b in divisors if est(b) <= vmem_budget] or [1]
    if num_cores >= 2:
        sharded = [b for b in fitting if N // b >= num_cores]
        if sharded:
            fitting = sharded
    return max(fitting)


def multi_head_attention(Q, K, V, attention_mask, params, *,
                         num_heads, d_k, d_v,
                         batch_block=None, compute_dtype=jnp.float32):
    N, q_len, d_model = Q.shape
    k_len = K.shape[1]
    wq, bq, wk, bk, wv, bv, wout, bout = params
    itemsize = jnp.dtype(compute_dtype).itemsize

    vmem_cap, num_cores = _tpu_budget()
    vmem_limit = int(max(32 * 1024 * 1024, min(0.7 * vmem_cap, 96 * 1024 * 1024)))
    if batch_block is None:
        batch_block = _pick_batch_block(N, q_len, k_len, d_model, num_heads,
                                        d_k, d_v, itemsize,
                                        int(0.6 * vmem_limit), num_cores)
    assert N % batch_block == 0

    # Flatten activations so each grid step sees (batch_block*seq, d_model) slabs;
    # mask travels as int8 (nonzero == masked).
    xq = Q.reshape(N * q_len, d_model).astype(compute_dtype)
    xk = K.reshape(N * k_len, d_model).astype(compute_dtype)
    xv = V.reshape(N * k_len, d_model).astype(compute_dtype)
    mask_i8 = (attention_mask != 0).astype(jnp.int8)

    # Flat weight layout (lane-dense MXU N-dim).  The 1/sqrt(d_k) scale is folded
    # into the query projection (constant weight-side transform, free at trace time).
    # Biases stay f32 so they are added after the f32-accumulated matmuls.
    scale = np.float32(1.0 / np.sqrt(d_k))
    wq_f = (wq * scale).astype(compute_dtype)
    bq_f = (bq * scale).reshape(1, num_heads * d_k).astype(jnp.float32)
    wk_f = wk.astype(compute_dtype)
    bk_f = bk.reshape(1, num_heads * d_k).astype(jnp.float32)
    wv_f = wv.astype(compute_dtype)
    bv_f = bv.reshape(1, num_heads * d_v).astype(jnp.float32)
    wo_f = wout.astype(compute_dtype)
    bo_f = bout.reshape(1, d_model).astype(jnp.float32)

    mq = batch_block * q_len
    mk = batch_block * k_len
    grid = (N // batch_block,)

    kernel = functools.partial(
        mha_kernel, num_heads=num_heads, d_k=d_k, d_v=d_v,
        q_len=q_len, k_len=k_len, batch_block=batch_block,
        compute_dtype=compute_dtype)

    out_flat = pl.pallas_call(
        kernel,
        out_shape=jax.ShapeDtypeStruct((N * q_len, d_model), jnp.float32),
        grid_spec=pltpu.PrefetchScalarGridSpec(
            num_scalar_prefetch=0,
            grid=grid,
            in_specs=[
                pl.BlockSpec((mq, d_model), lambda i: (i, 0)),                   # Q tokens
                pl.BlockSpec((mk, d_model), lambda i: (i, 0)),                   # K tokens
                pl.BlockSpec((mk, d_model), lambda i: (i, 0)),                   # V tokens
                pl.BlockSpec((batch_block, q_len, k_len), lambda i: (i, 0, 0)),  # mask
                _replicated_spec(wq_f.shape), _replicated_spec(bq_f.shape),
                _replicated_spec(wk_f.shape), _replicated_spec(bk_f.shape),
                _replicated_spec(wv_f.shape), _replicated_spec(bv_f.shape),
                _replicated_spec(wo_f.shape), _replicated_spec(bo_f.shape),
            ],
            out_specs=pl.BlockSpec((mq, d_model), lambda i: (i, 0)),
        ),
        compiler_params=pltpu.CompilerParams(
            dimension_semantics=("parallel",),
            vmem_limit_bytes=vmem_limit,
        ),
    )(xq, xk, xv, mask_i8, wq_f, bq_f, wk_f, bk_f, wv_f, bv_f, wo_f, bo_f)

    return out_flat.reshape(N, q_len, d_model)


def init_params(key, d_model, d_k, d_v, num_heads):
    # Matches the PyTorch init distributions; weights stored as (in, out).
    ks = jax.random.split(key, 8)
    std_qk = np.sqrt(2.0 / (d_model + d_k))
    std_v = np.sqrt(2.0 / (d_model + d_v))
    wq = jax.random.normal(ks[0], (d_model, d_k * num_heads), jnp.float32) * std_qk
    wk = jax.random.normal(ks[1], (d_model, d_k * num_heads), jnp.float32) * std_qk
    wv = jax.random.normal(ks[2], (d_model, d_v * num_heads), jnp.float32) * std_v
    wout = jax.random.normal(ks[3], (d_v * num_heads, d_model), jnp.float32) * std_v
    # PyTorch Linear default bias init: U(-1/sqrt(fan_in), 1/sqrt(fan_in)).
    bq = jax.random.uniform(ks[4], (1, d_k * num_heads), jnp.float32,
                            -1.0 / np.sqrt(d_model), 1.0 / np.sqrt(d_model))
    bk = jax.random.uniform(ks[5], (1, d_k * num_heads), jnp.float32,
                            -1.0 / np.sqrt(d_model), 1.0 / np.sqrt(d_model))
    bv = jax.random.uniform(ks[6], (1, d_v * num_heads), jnp.float32,
                            -1.0 / np.sqrt(d_model), 1.0 / np.sqrt(d_model))
    bout = jax.random.uniform(ks[7], (1, d_model), jnp.float32,
                              -1.0 / np.sqrt(d_v * num_heads), 1.0 / np.sqrt(d_v * num_heads))
    return wq, bq, wk, bk, wv, bv, wout, bout


def reference_mha(Q, K, V, mask, params, *, num_heads, d_k, d_v):
    wq, bq, wk, bk, wv, bv, wout, bout = params
    N, q_len, _ = Q.shape
    k_len = K.shape[1]
    Qp = (Q @ wq + bq).reshape(N, q_len, num_heads, d_k).transpose(0, 2, 1, 3)
    Kp = (K @ wk + bk).reshape(N, k_len, num_heads, d_k).transpose(0, 2, 1, 3)
    Vp = (V @ wv + bv).reshape(N, k_len, num_heads, d_v).transpose(0, 2, 1, 3)
    scores = jnp.einsum("nhqd,nhkd->nhqk", Qp, Kp) / np.sqrt(d_k)
    scores = jnp.where(mask[:, None, :, :] != 0, -10000.0, scores)
    attn = jax.nn.softmax(scores, axis=-1)
    ctx = jnp.einsum("nhqk,nhkd->nhqd", attn, Vp)
    ctx = ctx.transpose(0, 2, 1, 3).reshape(N, q_len, num_heads * d_v)
    return ctx @ wout + bout


if __name__ == "__main__":
    N, q_len, k_len = 4, 8, 8
    d_model, d_k, d_v, num_heads = 32, 8, 8, 4

    key = jax.random.PRNGKey(0)
    kq, kk, kv, kp = jax.random.split(key, 4)
    Q = jax.random.normal(kq, (N, q_len, d_model), jnp.float32)
    K = jax.random.normal(kk, (N, k_len, d_model), jnp.float32)
    V = jax.random.normal(kv, (N, k_len, d_model), jnp.float32)

    # Padding-style mask: last two key positions are masked out (nonzero == masked).
    mask = jnp.zeros((N, q_len, k_len), jnp.float32).at[:, :, k_len - 2:].set(1.0)

    params = init_params(kp, d_model, d_k, d_v, num_heads)
    ref = reference_mha(Q, K, V, mask, params, num_heads=num_heads, d_k=d_k, d_v=d_v)

    # f32-operand path.  Tolerance tightened vs the previous version: the softmax
    # denominator's approximate reciprocal now gets one Newton refinement.
    out_f32 = multi_head_attention(Q, K, V, mask, params,
                                   num_heads=num_heads, d_k=d_k, d_v=d_v,
                                   compute_dtype=jnp.float32)
    out_f32 = jax.block_until_ready(out_f32)
    np.testing.assert_allclose(np.asarray(out_f32), np.asarray(ref),
                               rtol=2e-3, atol=2e-3)

    # bf16-operand path (v6e/v7x MXU peak), f32 accumulation and f32 softmax math.
    out_bf16 = multi_head_attention(Q, K, V, mask, params,
                                    num_heads=num_heads, d_k=d_k, d_v=d_v,
                                    compute_dtype=jnp.bfloat16)
    out_bf16 = jax.block_until_ready(out_bf16)
    np.testing.assert_allclose(np.asarray(out_bf16), np.asarray(ref),
                               rtol=5e-2, atol=8e-2)

    print("KERNEL_OK")
</pallas_src>

<mosaic_0001>
module attributes {stable_mosaic.version = 11 : i64} {
  func.func @mha_kernel(%arg0: i32, %arg1: memref<32x32xf32, #tpu.memory_space<vmem>>, %arg2: memref<32x32xf32, #tpu.memory_space<vmem>>, %arg3: memref<32x32xf32, #tpu.memory_space<vmem>>, %arg4: memref<4x8x8xi8, #tpu.memory_space<vmem>>, %arg5: memref<32x32xf32, #tpu.memory_space<vmem>>, %arg6: memref<1x32xf32, #tpu.memory_space<vmem>>, %arg7: memref<32x32xf32, #tpu.memory_space<vmem>>, %arg8: memref<1x32xf32, #tpu.memory_space<vmem>>, %arg9: memref<32x32xf32, #tpu.memory_space<vmem>>, %arg10: memref<1x32xf32, #tpu.memory_space<vmem>>, %arg11: memref<32x32xf32, #tpu.memory_space<vmem>>, %arg12: memref<1x32xf32, #tpu.memory_space<vmem>>, %arg13: memref<32x32xf32, #tpu.memory_space<vmem>>) attributes {dimension_semantics = [#tpu.dimension_semantics<parallel>], iteration_bounds = array<i64: 1>, scalar_prefetch = 0 : i64, scratch_operands = 0 : i64, tpu.core_type = #tpu.core_type<tc>, window_params = [{transform_indices = @transform_0, window_bounds = array<i64: 32, 32>}, {transform_indices = @transform_1, window_bounds = array<i64: 32, 32>}, {transform_indices = @transform_2, window_bounds = array<i64: 32, 32>}, {transform_indices = @transform_3, window_bounds = array<i64: 4, 8, 8>}, {pipeline_mode = #tpu.pipeline_mode<synchronous>, transform_indices = @transform_4, window_bounds = array<i64: 32, 32>}, {pipeline_mode = #tpu.pipeline_mode<synchronous>, transform_indices = @transform_5, window_bounds = array<i64: 1, 32>}, {pipeline_mode = #tpu.pipeline_mode<synchronous>, transform_indices = @transform_6, window_bounds = array<i64: 32, 32>}, {pipeline_mode = #tpu.pipeline_mode<synchronous>, transform_indices = @transform_7, window_bounds = array<i64: 1, 32>}, {pipeline_mode = #tpu.pipeline_mode<synchronous>, transform_indices = @transform_8, window_bounds = array<i64: 32, 32>}, {pipeline_mode = #tpu.pipeline_mode<synchronous>, transform_indices = @transform_9, window_bounds = array<i64: 1, 32>}, {pipeline_mode = #tpu.pipeline_mode<synchronous>, transform_indices = @transform_10, window_bounds = array<i64: 32, 32>}, {pipeline_mode = #tpu.pipeline_mode<synchronous>, transform_indices = @transform_11, window_bounds = array<i64: 1, 32>}, {transform_indices = @transform_12, window_bounds = array<i64: 32, 32>}]} {
    %c0 = arith.constant 0 : index
    %c0_0 = arith.constant 0 : index
    %0 = vector.load %arg1[%c0, %c0_0] : memref<32x32xf32, #tpu.memory_space<vmem>>, vector<32x32xf32>
    %c0_1 = arith.constant 0 : index
    %c0_2 = arith.constant 0 : index
    %1 = vector.load %arg5[%c0_1, %c0_2] : memref<32x32xf32, #tpu.memory_space<vmem>>, vector<32x32xf32>
    %cst = arith.constant dense<0.000000e+00> : vector<32x32xf32>
    %2 = tpu.matmul %0, %1, %cst {dimension_numbers = #tpu.dot_dimension_numbers<[1], [0], [0], [1], [0, 0, 1, 1], [], []>} : vector<32x32xf32>, vector<32x32xf32>, vector<32x32xf32> -> vector<32x32xf32>
    %c0_3 = arith.constant 0 : index
    %c0_4 = arith.constant 0 : index
    %3 = vector.load %arg6[%c0_3, %c0_4] : memref<1x32xf32, #tpu.memory_space<vmem>>, vector<1x32xf32>
    %4 = vector.broadcast %3 : vector<1x32xf32> to vector<32x32xf32>
    %5 = arith.addf %2, %4 : vector<32x32xf32>
    %c0_5 = arith.constant 0 : index
    %c0_6 = arith.constant 0 : index
    %6 = vector.load %arg2[%c0_5, %c0_6] : memref<32x32xf32, #tpu.memory_space<vmem>>, vector<32x32xf32>
    %c0_7 = arith.constant 0 : index
    %c0_8 = arith.constant 0 : index
    %7 = vector.load %arg7[%c0_7, %c0_8] : memref<32x32xf32, #tpu.memory_space<vmem>>, vector<32x32xf32>
    %cst_9 = arith.constant dense<0.000000e+00> : vector<32x32xf32>
    %8 = tpu.matmul %6, %7, %cst_9 {dimension_numbers = #tpu.dot_dimension_numbers<[1], [0], [0], [1], [0, 0, 1, 1], [], []>} : vector<32x32xf32>, vector<32x32xf32>, vector<32x32xf32> -> vector<32x32xf32>
    %c0_10 = arith.constant 0 : index
    %c0_11 = arith.constant 0 : index
    %9 = vector.load %arg8[%c0_10, %c0_11] : memref<1x32xf32, #tpu.memory_space<vmem>>, vector<1x32xf32>
    %10 = vector.broadcast %9 : vector<1x32xf32> to vector<32x32xf32>
    %11 = arith.addf %8, %10 : vector<32x32xf32>
    %c0_12 = arith.constant 0 : index
    %c0_13 = arith.constant 0 : index
    %12 = vector.load %arg3[%c0_12, %c0_13] : memref<32x32xf32, #tpu.memory_space<vmem>>, vector<32x32xf32>
    %c0_14 = arith.constant 0 : index
    %c0_15 = arith.constant 0 : index
    %13 = vector.load %arg9[%c0_14, %c0_15] : memref<32x32xf32, #tpu.memory_space<vmem>>, vector<32x32xf32>
    %cst_16 = arith.constant dense<0.000000e+00> : vector<32x32xf32>
    %14 = tpu.matmul %12, %13, %cst_16 {dimension_numbers = #tpu.dot_dimension_numbers<[1], [0], [0], [1], [0, 0, 1, 1], [], []>} : vector<32x32xf32>, vector<32x32xf32>, vector<32x32xf32> -> vector<32x32xf32>
    %c0_17 = arith.constant 0 : index
    %c0_18 = arith.constant 0 : index
    %15 = vector.load %arg10[%c0_17, %c0_18] : memref<1x32xf32, #tpu.memory_space<vmem>>, vector<1x32xf32>
    %16 = vector.broadcast %15 : vector<1x32xf32> to vector<32x32xf32>
    %17 = arith.addf %14, %16 : vector<32x32xf32>
    %18 = vector.shape_cast %5 : vector<32x32xf32> to vector<32x4x8xf32>
    %19 = tpu.transpose %18, [1, 0, 2] : vector<32x4x8xf32> -> vector<4x32x8xf32>
    %20 = vector.shape_cast %19 : vector<4x32x8xf32> to vector<16x8x8xf32>
    %21 = vector.shape_cast %11 : vector<32x32xf32> to vector<32x4x8xf32>
    %22 = tpu.transpose %21, [1, 0, 2] : vector<32x4x8xf32> -> vector<4x32x8xf32>
    %23 = vector.shape_cast %22 : vector<4x32x8xf32> to vector<16x8x8xf32>
    %24 = vector.shape_cast %17 : vector<32x32xf32> to vector<32x4x8xf32>
    %25 = tpu.transpose %24, [1, 0, 2] : vector<32x4x8xf32> -> vector<4x32x8xf32>
    %26 = vector.shape_cast %25 : vector<4x32x8xf32> to vector<16x8x8xf32>
    "tpu.trace_start"() <{level = 10 : i32, message = "gqd,gkd->gqk"}> : () -> ()
    %cst_19 = arith.constant dense<0.000000e+00> : vector<16x8x8xf32>
    %27 = tpu.matmul %20, %23, %cst_19 {dimension_numbers = #tpu.dot_dimension_numbers<[2], [2], [1], [1], [0, 0, 0, 1, 1, 1], [0], [0]>} : vector<16x8x8xf32>, vector<16x8x8xf32>, vector<16x8x8xf32> -> vector<16x8x8xf32>
    "tpu.trace_stop"() : () -> ()
    %c0_20 = arith.constant 0 : index
    %c0_21 = arith.constant 0 : index
    %c0_22 = arith.constant 0 : index
    %28 = vector.load %arg4[%c0_20, %c0_21, %c0_22] : memref<4x8x8xi8, #tpu.memory_space<vmem>>, vector<4x8x8xi8>
    %c0_i8 = arith.constant 0 : i8
    %29 = vector.broadcast %c0_i8 : i8 to vector<4x8x8xi8>
    %30 = arith.cmpi ne, %28, %29 : vector<4x8x8xi8>
    %31 = vector.shape_cast %27 : vector<16x8x8xf32> to vector<4x4x8x8xf32>
    %cst_23 = arith.constant -1.000000e+04 : f32
    %32 = vector.shape_cast %30 : vector<4x8x8xi1> to vector<1x4x8x8xi1>
    %33 = vector.broadcast %32 : vector<1x4x8x8xi1> to vector<4x4x8x8xi1>
    %34 = vector.broadcast %cst_23 : f32 to vector<4x4x8x8xf32>
    %35 = arith.select %33, %34, %31 : vector<4x4x8x8xi1>, vector<4x4x8x8xf32>
    %36 = vector.shape_cast %35 : vector<4x4x8x8xf32> to vector<16x8x8xf32>
    %cst_24 = arith.constant dense<0xFF800000> : vector<16x8xf32>
    %37 = vector.multi_reduction <maximumf>, %36, %cst_24 [2] : vector<16x8x8xf32> to vector<16x8xf32>
    %38 = vector.shape_cast %37 : vector<16x8xf32> to vector<16x8x1xf32>
    %39 = vector.broadcast %38 : vector<16x8x1xf32> to vector<16x8x8xf32>
    %40 = arith.subf %36, %39 : vector<16x8x8xf32>
    %41 = math.exp %40 : vector<16x8x8xf32>
    %cst_25 = arith.constant dense<0.000000e+00> : vector<16x8xf32>
    %42 = vector.multi_reduction <add>, %41, %cst_25 [2] : vector<16x8x8xf32> to vector<16x8xf32>
    %43 = vector.shape_cast %42 : vector<16x8xf32> to vector<16x8x1xf32>
    "tpu.trace_start"() <{level = 10 : i32, message = "gqk,gkd->gqd"}> : () -> ()
    %cst_26 = arith.constant dense<0.000000e+00> : vector<16x8x8xf32>
    %44 = tpu.matmul %41, %26, %cst_26 {dimension_numbers = #tpu.dot_dimension_numbers<[2], [1], [1], [2], [0, 0, 0, 1, 1, 2], [0], [0]>} : vector<16x8x8xf32>, vector<16x8x8xf32>, vector<16x8x8xf32> -> vector<16x8x8xf32>
    "tpu.trace_stop"() : () -> ()
    %45 = tpu.reciprocal %43 {approx = true} : vector<16x8x1xf32> -> vector<16x8x1xf32>
    %46 = arith.mulf %43, %45 : vector<16x8x1xf32>
    %cst_27 = arith.constant 2.000000e+00 : f32
    %47 = vector.broadcast %cst_27 : f32 to vector<16x8x1xf32>
    %48 = arith.subf %47, %46 : vector<16x8x1xf32>
    %49 = arith.mulf %45, %48 : vector<16x8x1xf32>
    %50 = vector.broadcast %49 : vector<16x8x1xf32> to vector<16x8x8xf32>
    %51 = arith.mulf %44, %50 : vector<16x8x8xf32>
    %52 = vector.shape_cast %51 : vector<16x8x8xf32> to vector<4x32x8xf32>
    %53 = tpu.transpose %52, [1, 0, 2] : vector<4x32x8xf32> -> vector<32x4x8xf32>
    %54 = vector.shape_cast %53 : vector<32x4x8xf32> to vector<32x32xf32>
    %c0_28 = arith.constant 0 : index
    %c0_29 = arith.constant 0 : index
    %55 = vector.load %arg11[%c0_28, %c0_29] : memref<32x32xf32, #tpu.memory_space<vmem>>, vector<32x32xf32>
    %cst_30 = arith.constant dense<0.000000e+00> : vector<32x32xf32>
    %56 = tpu.matmul %54, %55, %cst_30 {dimension_numbers = #tpu.dot_dimension_numbers<[1], [0], [0], [1], [0, 0, 1, 1], [], []>} : vector<32x32xf32>, vector<32x32xf32>, vector<32x32xf32> -> vector<32x32xf32>
    %c0_31 = arith.constant 0 : index
    %c0_32 = arith.constant 0 : index
    %57 = vector.load %arg12[%c0_31, %c0_32] : memref<1x32xf32, #tpu.memory_space<vmem>>, vector<1x32xf32>
    %58 = vector.broadcast %57 : vector<1x32xf32> to vector<32x32xf32>
    %59 = arith.addf %56, %58 : vector<32x32xf32>
    %c0_33 = arith.constant 0 : index
    %c0_34 = arith.constant 0 : index
    %60 = vector.load %arg13[%c0_33, %c0_34] : memref<32x32xf32, #tpu.memory_space<vmem>>, vector<32x32xf32>
    tpu.vector_store %arg13[%c0_33, %c0_34], %59 {strides = array<i32>} : memref<32x32xf32, #tpu.memory_space<vmem>>, vector<32x32xf32>,
    return
  }
  func.func @transform_0(%arg0: i32) -> (i32, i32) {
    %c0_i32 = arith.constant 0 : i32
    %c0_i32_0 = arith.constant 0 : i32
    return %arg0, %c0_i32 : i32, i32
  }
  func.func @transform_1(%arg0: i32) -> (i32, i32) {
    %c0_i32 = arith.constant 0 : i32
    %c0_i32_0 = arith.constant 0 : i32
    return %arg0, %c0_i32 : i32, i32
  }
  func.func @transform_2(%arg0: i32) -> (i32, i32) {
    %c0_i32 = arith.constant 0 : i32
    %c0_i32_0 = arith.constant 0 : i32
    return %arg0, %c0_i32 : i32, i32
  }
  func.func @transform_3(%arg0: i32) -> (i32, i32, i32) {
    %c0_i32 = arith.constant 0 : i32
    %c0_i32_0 = arith.constant 0 : i32
    %c0_i32_1 = arith.constant 0 : i32
    return %arg0, %c0_i32, %c0_i32_0 : i32, i32, i32
  }
  func.func @transform_4(%arg0: i32) -> (i32, i32) {
    %c0_i32 = arith.constant 0 : i32
    %c0_i32_0 = arith.constant 0 : i32
    %c0_i32_1 = arith.constant 0 : i32
    return %c0_i32, %c0_i32_0 : i32, i32
  }
  func.func @transform_5(%arg0: i32) -> (i32, i32) {
    %c0_i32 = arith.constant 0 : i32
    %c0_i32_0 = arith.constant 0 : i32
    %c0_i32_1 = arith.constant 0 : i32
    return %c0_i32, %c0_i32_0 : i32, i32
  }
  func.func @transform_6(%arg0: i32) -> (i32, i32) {
    %c0_i32 = arith.constant 0 : i32
    %c0_i32_0 = arith.constant 0 : i32
    %c0_i32_1 = arith.constant 0 : i32
    return %c0_i32, %c0_i32_0 : i32, i32
  }
  func.func @transform_7(%arg0: i32) -> (i32, i32) {
    %c0_i32 = arith.constant 0 : i32
    %c0_i32_0 = arith.constant 0 : i32
    %c0_i32_1 = arith.constant 0 : i32
    return %c0_i32, %c0_i32_0 : i32, i32
  }
  func.func @transform_8(%arg0: i32) -> (i32, i32) {
    %c0_i32 = arith.constant 0 : i32
    %c0_i32_0 = arith.constant 0 : i32
    %c0_i32_1 = arith.constant 0 : i32
    return %c0_i32, %c0_i32_0 : i32, i32
  }
  func.func @transform_9(%arg0: i32) -> (i32, i32) {
    %c0_i32 = arith.constant 0 : i32
    %c0_i32_0 = arith.constant 0 : i32
    %c0_i32_1 = arith.constant 0 : i32
    return %c0_i32, %c0_i32_0 : i32, i32
  }
  func.func @transform_10(%arg0: i32) -> (i32, i32) {
    %c0_i32 = arith.constant 0 : i32
    %c0_i32_0 = arith.constant 0 : i32
    %c0_i32_1 = arith.constant 0 : i32
    return %c0_i32, %c0_i32_0 : i32, i32
  }
  func.func @transform_11(%arg0: i32) -> (i32, i32) {
    %c0_i32 = arith.constant 0 : i32
    %c0_i32_0 = arith.constant 0 : i32
    %c0_i32_1 = arith.constant 0 : i32
    return %c0_i32, %c0_i32_0 : i32, i32
  }
  func.func @transform_12(%arg0: i32) -> (i32, i32) {
    %c0_i32 = arith.constant 0 : i32
    %c0_i32_0 = arith.constant 0 : i32
    return %arg0, %c0_i32 : i32, i32
  }
}

</mosaic_0001>

<bundles_post_ra>
// kernel: tpu_custom_call.1
= control target key start
LH: loop header
LB: loop body
LE: loop exit
PB: predicated region body
PF: predicated region fallthrough
CT: control target
= control target key end

     0   :  { %17 = vsyncpa [#allocation3], 0  ;;  %s7633_s0 = inlined_call_operand.hbm [shape: f32[32,32], index: 0, kind: input, shape index: {}]   ;;  %s7634_s1 = inlined_call_operand.hbm [shape: f32[32,32], index: 1, kind: input, shape index: {}]   ;;  %s7635_s2 = inlined_call_operand.hbm [shape: f32[32,32], index: 2, kind: input, shape index: {}]   ;;  %s7636_s3 = inlined_call_operand.hbm [shape: s8[4,8,8], index: 3, kind: input, shape index: {}]   ;;  %s7637_s4 = inlined_call_operand.hbm [shape: f32[32,32], index: 4, kind: input, shape index: {}]   ;;  %s7638_s5 = inlined_call_operand.vmem [shape: f32[1,32], index: 5, kind: input, shape index: {}]   ;;  %s7639_s6 = inlined_call_operand.hbm [shape: f32[32,32], index: 6, kind: input, shape index: {}]   ;;  %s7640_s7 = inlined_call_operand.vmem [shape: f32[1,32], index: 7, kind: input, shape index: {}]   ;;  %s7641_s8 = inlined_call_operand.hbm [shape: f32[32,32], index: 8, kind: input, shape index: {}]   ;;  %s7642_s9 = inlined_call_operand.vmem [shape: f32[1,32], index: 9, kind: input, shape index: {}]   ;;  %s7643_s10 = inlined_call_operand.hbm [shape: f32[32,32], index: 10, kind: input, shape index: {}]   ;;  %s7644_s11 = inlined_call_operand.vmem [shape: f32[1,32], index: 11, kind: input, shape index: {}]   ;;  %s7645_s12 = inlined_call_operand.hbm [shape: f32[32,32], index: 12, kind: output, shape index: {}]  }
   0x1   :  { %18 = vsyncpa [#allocation6], 0 }
   0x2   :  { %19 = vsyncpa [#allocation9], 0 }
   0x3   :  { %20 = vsyncpa [#allocation12], 0 }
   0x4   :  { %21 = vsyncpa [#allocation15], 0 }
   0x5   :  { %22 = vsyncpa [#allocation4], 0  ;;  %s6325_s21 = smov [#allocation5]   ;;  %s6326_s23 = smov [#allocation8]  }
   0x6   :  { %s40_s22 = sshll.u32 %s6325_s21, 4  ;;  %s64_s24 = sshll.u32 %s6326_s23, 4  ;;  %s41_s22 = int_to_ptr.vmem [resolvable:$true] %s40_s22  ;;  %s65_s24 = int_to_ptr.vmem [resolvable:$true] %s64_s24 }
   0x7   :  { %s6141_s25 = scalar_lea.vmem %s41_s22, 512  ;;  %p6146_p1 = scmp.lt.s32.totalorder %s41_s22, %s41_s22 }
   0x8   :  { %p6142_p0 = scmp.ne.s32.totalorder %s41_s22, %s6141_s25  ;;  %p6147_p2 = scmp.lt.s32.totalorder %s6141_s25, %s6141_s25 }
   0xa   :  { %p6148_p3 = por %p6147_p2, %p6146_p1 }
   0xc   :  { %p6149_p4 = pnand %p6148_p3, %p6142_p0 }
   0xe   :  { %6152 = shalt.err (!%p6149_p4)
}
   0xf   :  { %s6327_s26 = smov 128   ;;  %s6328_s27 = smov 8  }
  0x10   :  { %46 = dma.hbm_to_vmem [thread:$0]  %s7634_s1, 512, %s41_s22, [#allocation6], %s6327_s26, %s6327_s26, %s6328_s27  }
  0x11   :  { %s6161_s30 = scalar_lea.vmem %s65_s24, 128  ;;  %p6166_p6 = scmp.lt.s32.totalorder %s65_s24, %s65_s24 }
  0x12   :  { %p6162_p5 = scmp.ne.s32.totalorder %s65_s24, %s6161_s30  ;;  %p6167_p7 = scmp.lt.s32.totalorder %s6161_s30, %s6161_s30 }
  0x14   :  { %p6168_p8 = por %p6167_p7, %p6166_p6 }
  0x16   :  { %p6169_p9 = pnand %p6168_p8, %p6162_p5 }
  0x18   :  { %6172 = shalt.err (!%p6169_p9)
}
  0x19   :  { %s6329_s13 = smov 32   ;;  %s6330_s14 = smov 2  }
  0x1a   :  { %70 = dma.hbm_to_vmem [thread:$0]  %s7636_s3, 128, %s65_s24, [#allocation9], %s6329_s13, %s6329_s13, %s6330_s14  }
  0x1b   :  { %s6331_s17 = smov [#allocation11]   ;;  %s6332_s19 = smov [#allocation2]  }
  0x1c   :  { %s90_s18 = sshll.u32 %s6331_s17, 4  ;;  %s28_s20 = sshll.u32 %s6332_s19, 4  ;;  %s91_s18 = int_to_ptr.vmem [resolvable:$true] %s90_s18  ;;  %s29_s20 = int_to_ptr.vmem [resolvable:$true] %s28_s20 }
  0x1d   :  { %s6181_s1 = scalar_lea.vmem %s91_s18, 512  ;;  %p6186_p11 = scmp.lt.s32.totalorder %s91_s18, %s91_s18 }
  0x1e   :  { %p6182_p10 = scmp.ne.s32.totalorder %s91_s18, %s6181_s1  ;;  %p6187_p12 = scmp.lt.s32.totalorder %s6181_s1, %s6181_s1 }
  0x20   :  { %p6188_p13 = por %p6187_p12, %p6186_p11 }
  0x22   :  { %p6189_p0 = pnand %p6188_p13, %p6182_p10 }
  0x24   :  { %6192 = shalt.err (!%p6189_p0)
}
  0x25   :  { %96 = dma.hbm_to_vmem [thread:$0]  %s7639_s6, 512, %s91_s18, [#allocation12], %s6327_s26, %s6327_s26, %s6328_s27  }
  0x26   :  { %s6201_s3 = scalar_lea.vmem %s29_s20, 512  ;;  %p6206_p2 = scmp.lt.s32.totalorder %s29_s20, %s29_s20 }
  0x27   :  { %p6202_p1 = scmp.ne.s32.totalorder %s29_s20, %s6201_s3  ;;  %p6207_p3 = scmp.lt.s32.totalorder %s6201_s3, %s6201_s3 }
  0x29   :  { %p6208_p4 = por %p6207_p3, %p6206_p2 }
  0x2b   :  { %p6209_p5 = pnand %p6208_p4, %p6202_p1 }
  0x2d   :  { %6212 = shalt.err (!%p6209_p5)
}
  0x2e   :  { %34 = dma.hbm_to_vmem [thread:$0]  %s7633_s0, 512, %s29_s20, [#allocation3], %s6327_s26, %s6327_s26, %s6328_s27  }
  0x2f   :  { %s6333_s25 = smov [#allocation7]   ;;  %s6334_s29 = smov [#allocation10]  }
  0x30   :  { %s52_s28 = sshll.u32 %s6333_s25, 4  ;;  %s76_s30 = sshll.u32 %s6334_s29, 4  ;;  %s53_s28 = int_to_ptr.vmem [resolvable:$true] %s52_s28  ;;  %s77_s30 = int_to_ptr.vmem [resolvable:$true] %s76_s30 }
  0x31   :  { %s6221_s6 = scalar_lea.vmem %s53_s28, 512  ;;  %p6226_p7 = scmp.lt.s32.totalorder %s53_s28, %s53_s28 }
  0x32   :  { %p6222_p6 = scmp.ne.s32.totalorder %s53_s28, %s6221_s6  ;;  %p6227_p8 = scmp.lt.s32.totalorder %s6221_s6, %s6221_s6 }
  0x34   :  { %p6228_p9 = por %p6227_p8, %p6226_p7 }
  0x36   :  { %p6229_p10 = pnand %p6228_p9, %p6222_p6 }
  0x38   :  { %6232 = shalt.err (!%p6229_p10)
}
  0x39   :  { %58 = dma.hbm_to_vmem [thread:$0]  %s7635_s2, 512, %s53_s28, [#allocation6], %s6327_s26, %s6327_s26, %s6328_s27  }
  0x3a   :  { %s6241_s0 = scalar_lea.vmem %s77_s30, 512  ;;  %p6246_p12 = scmp.lt.s32.totalorder %s77_s30, %s77_s30 }
  0x3b   :  { %p6242_p11 = scmp.ne.s32.totalorder %s77_s30, %s6241_s0  ;;  %p6247_p13 = scmp.lt.s32.totalorder %s6241_s0, %s6241_s0 }
  0x3d   :  { %p6248_p0 = por %p6247_p13, %p6246_p12 }
  0x3f   :  { %p6249_p1 = pnand %p6248_p0, %p6242_p11 }
  0x41   :  { %6252 = shalt.err (!%p6249_p1)
}
  0x42   :  { %82 = dma.hbm_to_vmem [thread:$0]  %s7637_s4, 512, %s77_s30, [#allocation9], %s6327_s26, %s6327_s26, %s6328_s27  }
  0x43   :  { %s6335_s17 = smov [#allocation13]   ;;  %s6336_s19 = smov [#allocation14]  }
  0x44   :  { %s104_s18 = sshll.u32 %s6335_s17, 4  ;;  %s118_s20 = sshll.u32 %s6336_s19, 4  ;;  %s105_s18 = int_to_ptr.vmem [resolvable:$true] %s104_s18  ;;  %s119_s20 = int_to_ptr.vmem [resolvable:$true] %s118_s20 }
  0x45   :  { %s6261_s2 = scalar_lea.vmem %s105_s18, 512  ;;  %p6266_p3 = scmp.lt.s32.totalorder %s105_s18, %s105_s18 }
  0x46   :  { %p6262_p2 = scmp.ne.s32.totalorder %s105_s18, %s6261_s2  ;;  %p6267_p4 = scmp.lt.s32.totalorder %s6261_s2, %s6261_s2 }
  0x48   :  { %p6268_p5 = por %p6267_p4, %p6266_p3 }
  0x4a   :  { %p6269_p6 = pnand %p6268_p5, %p6262_p2 }
  0x4c   :  { %6272 = shalt.err (!%p6269_p6)
}
  0x4d   :  { %110 = dma.hbm_to_vmem [thread:$0]  %s7641_s8, 512, %s105_s18, [#allocation12], %s6327_s26, %s6327_s26, %s6328_s27  }
  0x4e   :  { %s6281_s4 = scalar_lea.vmem %s119_s20, 512  ;;  %p6286_p8 = scmp.lt.s32.totalorder %s119_s20, %s119_s20 }
  0x4f   :  { %p6282_p7 = scmp.ne.s32.totalorder %s119_s20, %s6281_s4  ;;  %p6287_p9 = scmp.lt.s32.totalorder %s6281_s4, %s6281_s4 }
  0x51   :  { %p6288_p10 = por %p6287_p9, %p6286_p8 }
  0x53   :  { %p6289_p11 = pnand %p6288_p10, %p6282_p7 }
  0x55   :  { %6292 = shalt.err (!%p6289_p11)
}
  0x56   :  { %124 = dma.hbm_to_vmem [thread:$0]  %s7643_s10, 512, %s119_s20, [#allocation15], %s6327_s26, %s6327_s26, %s6328_s27  }
  0x57   :  { %6313 = dma.done.wait [#allocation3], 512  }
  0x58   :  { %6314 = vsyncadd [#allocation3], 4294966784 }
  0x59   :  { %6315 = dma.done.wait [#allocation6], 1024  }
  0x5a   :  { %6316 = vsyncadd [#allocation6], 4294966272 }
  0x5b   :  { %6317 = dma.done.wait [#allocation9], 640  }
  0x5c   :  { %6318 = vsyncadd [#allocation9], 4294966656 }
  0x5d   :  { %6319 = dma.done.wait [#allocation12], 1024  }
  0x5e   :  { %6320 = vsyncadd [#allocation12], 4294966272 }
  0x5f   :  { %6321 = dma.done.wait [#allocation15], 512  }
  0x60   :  { %6322 = vsyncadd [#allocation15], 4294966784  ;;  %vm168_vm0 = vcmask 261120   ;;  %v160_v0 = vld [vmem:[#allocation10 + $0x18] sm:$0xff]  ;;  %v159_v1 = vld [vmem:[#allocation10 + $0x10] sm:$0xff]  ;;  %s6337_s23 = smov 112   ;;  %v535_v54 = vlaneseq }
  0x61   :  { %5830 = vmatprep.subr.mxu1 %v160_v0  ;;  %v153_v2 = vld [vmem:[#allocation2] sm:$0xff]  ;;  %v158_v3 = vld [vmem:[#allocation10 + $0x8] sm:$0xff]  ;;  %v157_v4 = vld [vmem:[#allocation10] sm:$0xff]  ;;  %s6338_s24 = smov 120   ;;  %s6339_s25 = smov 104   ;;  %v6340_v42 = vmov 0.0  }
  0x62   :  { %5831 = vmatpush3.msra.mxu1 %v160_v0  ;;  %5838 = vmatprep.mubr.msk.f32.mxu1 %vm168_vm0, %v153_v2  ;;  %v385_v5 = vld [vmem:[#allocation13 + $0x18] sm:$0xff]  ;;  %v384_v6 = vld [vmem:[#allocation13 + $0x10] sm:$0xff]  ;;  %v154_v7 = vld [vmem:[#allocation2 + $0x8] sm:$0xff]  ;;  %vm6341_vm1 = vmmov 0   ;;  %v6342_v52 = vmov 1983009808  }
  0x63   :  { %5832 = vmatprep.subr.mxu1 %v159_v1  ;;  %v273_v8 = vld [vmem:[#allocation11 + $0x18] sm:$0xff]  ;;  %5858 = vmatprep.subr.mxu0 %v385_v5  ;;  %v155_v9 = vld [vmem:[#allocation2 + $0x10] sm:$0xff]  ;;  %v272_v10 = vld [vmem:[#allocation11 + $0x10] sm:$0xff]  ;;  %v533_v53 = vunpack.c.l.s4 %v6342_v52  ;;  %v6343_v55 = vmov 1934713408   ;;  %v536_v58 = vshrl.u32 %v535_v54, 7 }
  0x64   :  { %5833 = vmatpush3.msra.mxu1 %v159_v1  ;;  %5859 = vmatpush3.msra.mxu0 %v385_v5  ;;  %v383_v11 = vld [vmem:[#allocation13 + $0x8] sm:$0xff]  ;;  %v156_v12 = vld [vmem:[#allocation2 + $0x18] sm:$0xff]  ;;  %v266_v14 = vld [vmem:[#allocation5] sm:$0xff]  ;;  %v565_v56 = vunpack.c.l.s4 %v6343_v55  ;;  %vm2242_vm2 = vcmask 64512   ;;  %s6346_s30 = smov 16   ;;  %vm5491_vm11 = vcmask 130048  }
  0x65   :  { %5834 = vmatprep.subr.mxu1 %v158_v3  ;;  %5860 = vmatprep.subr.mxu0 %v384_v6  ;;  %v271_v13 = vld [vmem:[#allocation11 + $0x8] sm:$0xff]  ;;  %v270_v15 = vld [vmem:[#allocation11] sm:$0xff]  ;;  %v378_v19 = vld [vmem:[#allocation7] sm:$0xff]  ;;  %v534_v57 = vunpack.c.0.s8 %v533_v53  ;;  %vm5496_vm12 = vcmask 195584   ;;  %s6347_s14 = smov [#allocation16]  }
  0x66   :  { %5835 = vmatpush3.msra.mxu1 %v158_v3  ;;  %5861 = vmatpush3.msra.mxu0 %v384_v6  ;;  %v382_v16 = vld [vmem:[#allocation13] sm:$0xff]  ;;  %v268_v18 = vld [vmem:[#allocation5 + $0x10] sm:$0xff]  ;;  %v269_v21 = vld [vmem:[#allocation5 + $0x18] sm:$0xff]  ;;  %v566_v61 = vunpack.c.0.s8 %v565_v56  ;;  %s5618_s0 = sshll.u32 %s6347_s14, 4  ;;  %s5619_s0 = int_to_ptr.vmem [resolvable:$true] %s5618_s0 }
  0x67   :  { %5836 = vmatprep.subr.mxu1 %v157_v4  ;;  %5862 = vmatprep.subr.mxu0 %v383_v11  ;;  %v267_v17 = vld [vmem:[#allocation5 + $0x8] sm:$0xff]  ;;  %v380_v22 = vld [vmem:[#allocation7 + $0x10] sm:$0xff]  ;;  %v381_v23 = vld [vmem:[#allocation7 + $0x18] sm:$0xff]  ;;  %v6579_v62 = vsub.s32 %v534_v57, %v536_v58  ;;  %p6298_p13 = scmp.lt.s32.totalorder %s5619_s0, %s5619_s0 }
  0x68   :  { %5837 = vmatpush3.msra.mxu1 %v157_v4  ;;  %5863 = vmatpush3.msra.mxu0 %v383_v11  ;;  %v379_v20 = vld [vmem:[#allocation7 + $0x8] sm:$0xff]  ;;  %v5634_v24 = vld [vmem:[%s7638_s5] ss:$0 sm:$0xff]  ;;  %v6583_v5 = vsub.s32 %v566_v61, %v536_v58 }
  0x69   :  { %5839 = vmatmul.mubr.msk.f32.vlgmr.msra.gmra.mxu1 %vm168_vm0, %v154_v7  ;;  %5844 = vmatprep.subr.mxu1 %v273_v8  ;;  %v5639_v32 = vld [vmem:[%s7640_s7] ss:$0 sm:$0xff] }
  0x6a   :  { %5841 = vmatprep.mubr.msk.f32.mxu1 %vm168_vm0, %v155_v9  ;;  %5845 = vmatpush3.msra.mxu1 %v273_v8  ;;  %v5644_v44 = vld [vmem:[%s7642_s9] ss:$0 sm:$0xff]  ;;  %s6345_s9 = smov 24  }
  0x6b   :  { %5846 = vmatprep.subr.mxu1 %v272_v10  ;;  %5864 = vmatprep.subr.mxu0 %v382_v16 }
  0x6c   :  { %5847 = vmatpush3.msra.mxu1 %v272_v10  ;;  %5865 = vmatpush3.msra.mxu0 %v382_v16 }
  0x6d   :  { %5842 = vmatmul.mubr.msk.f32.gmra.mxu1 %vm168_vm0, %v156_v12  ;;  %5848 = vmatprep.subr.mxu1 %v271_v13 }
  0x6e   :  { %5849 = vmatpush3.msra.mxu1 %v271_v13  ;;  %5852 = vmatprep.mubr.msk.f32.mxu1 %vm168_vm0, %v266_v14 }
  0x6f   :  { %5850 = vmatprep.subr.mxu1 %v270_v15  ;;  %5866 = vmatprep.mubr.msk.f32.mxu0 %vm168_vm0, %v378_v19 }
  0x70   :  { %5851 = vmatpush3.msra.mxu1 %v270_v15  ;;  %5867 = vmatmul.mubr.msk.f32.vlgmr.msra.gmra.mxu0 %vm168_vm0, %v379_v20 }
  0x71   :  { %5853 = vmatmul.mubr.msk.f32.vlgmr.msra.gmra.mxu1 %vm168_vm0, %v267_v17  ;;  %5869 = vmatprep.mubr.msk.f32.mxu0 %vm168_vm0, %v380_v22 }
  0x72   :  { %5855 = vmatprep.mubr.msk.f32.mxu1 %vm168_vm0, %v268_v18  ;;  %5872 = vmatprep.subr.mxu1 %v6340_v42 }
  0x73   :  { %5882 = vmatprep.subr.mxu0 %v6340_v42 }
  0x74   :  { %5870 = vmatmul.mubr.msk.f32.gmra.mxu0 %vm168_vm0, %v381_v23 }
  0x75   :  { %5856 = vmatmul.mubr.msk.f32.gmra.mxu1 %vm168_vm0, %v269_v21  ;;  %5884 = vmatprep.mubr.msk.f32.mxu0 %vm6341_vm1, %v6340_v42 }
  0x76   :  { %5874 = vmatprep.mubr.msk.f32.mxu1 %vm6341_vm1, %v6340_v42 }
 0x129   :  { %v5840_v25 = vpop.f32.mrf.mxu1 }
 0x12a   :  { %v6473_v26 = vadd.f32 %v5840_v25, %v5634_v24 }
 0x12b   :  { %v247_v27 = vpop.f32.mrf.mxu1 }
 0x12c   :  { %508 = vrot.lane.b32.xlu0 %v6473_v26, %s6337_s23  ;;  %496 = vrot.lane.b32.xlu1 %v6473_v26, %s6338_s24  ;;  %v6479_v29 = vadd.f32 %v5634_v24, %v247_v27 }
 0x12d   :  { %v5843_v28 = vpop.f32.mrf.mxu1 }
 0x12e   :  { %v6500_v35 = vadd.f32 %v5843_v28, %v5634_v24 }
 0x12f   :  { %v257_v30 = vpop.f32.mrf.mxu1 }
 0x130   :  { %520 = vrot.lane.b32.xlu1 %v6473_v26, %s6339_s25  ;;  %506 = vrot.lane.b32.xlu0 %v6479_v29, %s6337_s23  ;;  %v6485_v31 = vadd.f32 %v5634_v24, %v257_v30  ;;  %v5868_v43 = vpop.f32.mrf.mxu0 }
 0x131   :  { %v5854_v33 = vpop.f32.mrf.mxu1  ;;  %v6555_v47 = vadd.f32 %v5868_v43, %v5644_v44 }
 0x132   :  { %v6494_v34 = vadd.f32 %v5854_v33, %v5639_v32  ;;  %v471_v45 = vpop.f32.mrf.mxu0 }
 0x133   :  { %v359_v36 = vpop.f32.mrf.mxu1  ;;  %v6549_v46 = vadd.f32 %v5644_v44, %v471_v45 }
 0x134   :  { %498 = vrot.lane.b32.xlu0 %v6485_v31, %s6338_s24  ;;  %494 = vrot.lane.b32.xlu1 %v6479_v29, %s6338_s24  ;;  %v6510_v37 = vadd.f32 %v5639_v32, %v359_v36  ;;  %v5871_v48 = vpop.f32.mrf.mxu0 }
 0x135   :  { %v5857_v38 = vpop.f32.mrf.mxu1  ;;  %v6571_v51 = vadd.f32 %v5871_v48, %v5644_v44 }
 0x136   :  { %v6516_v39 = vadd.f32 %v5857_v38, %v5639_v32  ;;  %v481_v49 = vpop.f32.mrf.mxu0 }
 0x137   :  { %v369_v40 = vpop.f32.mrf.mxu1  ;;  %v6565_v50 = vadd.f32 %v5644_v44, %v481_v49 }
 0x138   :  { %522 = vrot.lane.b32.xlu0 %v6485_v31, %s6339_s25  ;;  %518 = vrot.lane.b32.xlu1 %v6479_v29, %s6339_s25  ;;  %v6526_v41 = vadd.f32 %v5639_v32, %v369_v40 }
 0x13c   :  { %1080 = vrot.lane.b32.xlu0 %v6494_v34, %s6338_s24  ;;  %500 = vrot.lane.b32.xlu1 %v6500_v35, %s6338_s24 }
 0x140   :  { %1104 = vrot.lane.b32.xlu0 %v6494_v34, %s6339_s25  ;;  %510 = vrot.lane.b32.xlu1 %v6485_v31, %s6337_s23 }
 0x144   :  { %1078 = vrot.lane.b32.xlu0 %v6510_v37, %s6338_s24  ;;  %1092 = vrot.lane.b32.xlu1 %v6494_v34, %s6337_s23 }
 0x148   :  { %1090 = vrot.lane.b32.xlu0 %v6510_v37, %s6337_s23  ;;  %1102 = vrot.lane.b32.xlu1 %v6510_v37, %s6339_s25 }
 0x14c   :  { %1096 = vrot.lane.b32.xlu0 %v6516_v39, %s6337_s23  ;;  %1084 = vrot.lane.b32.xlu1 %v6516_v39, %s6338_s24 }
 0x150   :  { %1082 = vrot.lane.b32.xlu0 %v6526_v41, %s6338_s24  ;;  %1108 = vrot.lane.b32.xlu1 %v6516_v39, %s6339_s25 }
 0x154   :  { %1106 = vrot.lane.b32.xlu0 %v6526_v41, %s6339_s25  ;;  %1094 = vrot.lane.b32.xlu1 %v6526_v41, %s6337_s23 }
 0x158   :  { %512 = vrot.lane.b32.xlu0 %v6500_v35, %s6337_s23  ;;  %524 = vrot.lane.b32.xlu1 %v6500_v35, %s6339_s25 }
 0x15c   :  { %1662 = vrot.lane.b32.xlu1 %v6549_v46, %s6338_s24  ;;  %1674 = vrot.lane.b32.xlu0 %v6549_v46, %s6337_s23 }
 0x160   :  { %1686 = vrot.lane.b32.xlu1 %v6549_v46, %s6339_s25  ;;  %1676 = vrot.lane.b32.xlu0 %v6555_v47, %s6337_s23 }
 0x164   :  { %1664 = vrot.lane.b32.xlu1 %v6555_v47, %s6338_s24  ;;  %1666 = vrot.lane.b32.xlu0 %v6565_v50, %s6338_s24 }
 0x168   :  { %1688 = vrot.lane.b32.xlu1 %v6555_v47, %s6339_s25  ;;  %1690 = vrot.lane.b32.xlu0 %v6565_v50, %s6339_s25 }
 0x16c   :  { %1678 = vrot.lane.b32.xlu1 %v6565_v50, %s6337_s23  ;;  %1680 = vrot.lane.b32.xlu0 %v6571_v51, %s6337_s23 }
 0x170   :  { %1668 = vrot.lane.b32.xlu1 %v6571_v51, %s6338_s24 }
 0x19e   :  { %v509_v59 = vpop.permute.xlu0 %508  ;;  %v497_v60 = vpop.permute.xlu1 %496 }
 0x19f   :  { %v598_v63 = vcombine.low %v6473_v26, %v509_v59  ;;  %v599_v0 = vcombine.high %v6473_v26, %v509_v59 }
 0x1a1   :  { %v606_v6 = vrot.slane %v598_v63, %v6579_v62  ;;  %v613_v7 = vrot.slane %v599_v0, %v6579_v62 }
 0x1a2   :  { %v521_v1 = vpop.permute.xlu1 %520  ;;  %v507_v2 = vpop.permute.xlu0 %506 }
 0x1a3   :  { %v614_v3 = vcombine.low %v497_v60, %v521_v1  ;;  %v615_v4 = vcombine.high %v497_v60, %v521_v1  ;;  %v530_v20 = vcombine.low %v6479_v29, %v507_v2  ;;  %v531_v21 = vcombine.high %v6479_v29, %v507_v2 }
 0x1a5   :  { %v622_v8 = vrot.slane %v614_v3, %v6579_v62  ;;  %v629_v9 = vrot.slane %v615_v4, %v6579_v62  ;;  %v538_v32 = vrot.slane %v530_v20, %v6579_v62  ;;  %v545_v33 = vrot.slane %v531_v21, %v6579_v62 }
 0x1a6   :  { %v499_v10 = vpop.permute.xlu0 %498  ;;  %v495_v11 = vpop.permute.xlu1 %494 }
 0x1a7   :  { %v630_v12 = vcombine.low %v606_v6, %v622_v8  ;;  %v631_v13 = vcombine.high %v606_v6, %v622_v8  ;;  %v646_v14 = vcombine.low %v613_v7, %v629_v9  ;;  %v647_v15 = vcombine.high %v613_v7, %v629_v9 }
 0x1a9   :  { %v638_v16 = vrot.slane %v630_v12, %v6583_v5  ;;  %v645_v17 = vrot.slane %v631_v13, %v6583_v5  ;;  %v654_v18 = vrot.slane %v646_v14, %v6583_v5  ;;  %v661_v19 = vrot.slane %v647_v15, %v6583_v5 }
 0x1aa   :  { %v523_v22 = vpop.permute.xlu0 %522  ;;  %v519_v23 = vpop.permute.xlu1 %518 }
 0x1ab   :  { %v546_v24 = vcombine.low %v495_v11, %v519_v23  ;;  %v547_v25 = vcombine.high %v495_v11, %v519_v23  ;;  %v870_v26 = vcombine.low %v638_v16, %v645_v17  ;;  %v5651_v27 = vcombine.high %v638_v16, %v645_v17 }
 0x1ac   :  { %v886_v28 = vcombine.low %v654_v18, %v661_v19  ;;  %v5652_v30 = vcombine.high %v654_v18, %v661_v19  ;;  %v682_v29 = vcombine.low %v499_v10, %v523_v22  ;;  %v683_v44 = vcombine.high %v499_v10, %v523_v22 }
 0x1ad   :  { %v554_v36 = vrot.slane %v546_v24, %v6579_v62  ;;  %v561_v38 = vrot.slane %v547_v25, %v6579_v62  ;;  %v877_v53 = vrot.slane %v870_v26, %v6579_v62  ;;  %v885_v54 = vrot.slane %v5651_v27, %v6579_v62 }
 0x1ae   :  { %v1081_v40 = vpop.permute.xlu0 %1080  ;;  %v6599_v43 = vpop.permute.xlu1 %500  ;;  %v893_v55 = vrot.slane %v886_v28, %v6579_v62  ;;  %v901_v56 = vrot.slane %v5652_v30, %v6579_v62  ;;  %v690_v0 = vrot.slane %v682_v29, %v6579_v62  ;;  %v697_v1 = vrot.slane %v683_v44, %v6579_v62 }
 0x1af   :  { %v562_v45 = vcombine.low %v538_v32, %v554_v36  ;;  %v563_v48 = vcombine.high %v538_v32, %v554_v36  ;;  %v578_v49 = vcombine.low %v545_v33, %v561_v38  ;;  %v579_v52 = vcombine.high %v545_v33, %v561_v38 }
 0x1b0   :  { %v902_v9 = vcombine.low %v877_v53, %v885_v54  ;;  %v903_v10 = vcombine.high %v877_v53, %v885_v54  ;;  %v918_v13 = vcombine.low %v893_v55, %v901_v56  ;;  %v919_v14 = vcombine.high %v893_v55, %v901_v56 }
 0x1b1   :  { %v570_v57 = vrot.slane %v562_v45, %v6583_v5  ;;  %v577_v58 = vrot.slane %v563_v48, %v6583_v5  ;;  %v586_v59 = vrot.slane %v578_v49, %v6583_v5  ;;  %v593_v60 = vrot.slane %v579_v52, %v6583_v5 }
 0x1b2   :  { %v1105_v61 = vpop.permute.xlu0 %1104  ;;  %v511_v63 = vpop.permute.xlu1 %510  ;;  %v6639_v29 = vrot.slane %v918_v13, %v6583_v5  ;;  %v6642_v48 = vrot.slane %v903_v10, %v6583_v5  ;;  %v6645_v49 = vrot.slane %v919_v14, %v6583_v5 }
 0x1b3   :  { %v666_v2 = vcombine.low %v6485_v31, %v511_v63  ;;  %v667_v3 = vcombine.high %v6485_v31, %v511_v63  ;;  %v802_v4 = vcombine.low %v570_v57, %v577_v58  ;;  %v5649_v6 = vcombine.high %v570_v57, %v577_v58 }
 0x1b4   :  { %v818_v7 = vcombine.low %v586_v59, %v593_v60  ;;  %v5650_v8 = vcombine.high %v586_v59, %v593_v60  ;;  %v1198_v15 = vcombine.low %v1081_v40, %v1105_v61  ;;  %v1199_v16 = vcombine.high %v1081_v40, %v1105_v61 }
 0x1b5   :  { %v674_v11 = vrot.slane %v666_v2, %v6579_v62  ;;  %v681_v12 = vrot.slane %v667_v3, %v6579_v62  ;;  %v6618_v22 = vrot.slane %v802_v4, %v6579_v62  ;;  %v6621_v23 = vrot.slane %v5649_v6, %v6579_v62 }
 0x1b6   :  { %v6615_v17 = vpop.permute.xlu0 %1078  ;;  %v1093_v18 = vpop.permute.xlu1 %1092  ;;  %v6624_v24 = vrot.slane %v818_v7, %v6579_v62  ;;  %v6627_v25 = vrot.slane %v5650_v8, %v6579_v62  ;;  %v6636_v40 = vrot.slane %v902_v9, %v6583_v5  ;;  %v1206_v52 = vrot.slane %v1198_v15, %v6579_v62 }
 0x1b7   :  { %v698_v19 = vcombine.low %v674_v11, %v690_v0  ;;  %v699_v20 = vcombine.high %v674_v11, %v690_v0  ;;  %v714_v31 = vcombine.low %v681_v12, %v697_v1  ;;  %v715_v21 = vcombine.high %v681_v12, %v697_v1 }
 0x1b8   :  { %v1182_v32 = vcombine.low %v6494_v34, %v1093_v18  ;;  %v1183_v33 = vcombine.high %v6494_v34, %v1093_v18  ;;  %v1213_v34 = vrot.slane %v1199_v16, %v6579_v62  ;;  %v834_v55 = vcombine.low %v6618_v22, %v6621_v23 }
 0x1b9   :  { %v706_v26 = vrot.slane %v698_v19, %v6583_v5  ;;  %v713_v27 = vrot.slane %v699_v20, %v6583_v5  ;;  %v722_v28 = vrot.slane %v714_v31, %v6583_v5  ;;  %v729_v30 = vrot.slane %v715_v21, %v6583_v5 }
 0x1ba   :  { %v1091_v36 = vpop.permute.xlu0 %1090  ;;  %v1103_v38 = vpop.permute.xlu1 %1102  ;;  %v1190_v53 = vrot.slane %v1182_v32, %v6579_v62  ;;  %v1197_v54 = vrot.slane %v1183_v33, %v6579_v62  ;;  %v850_v56 = vcombine.low %v6624_v24, %v6627_v25  ;;  %v835_v11 = vcombine.high %v6618_v22, %v6621_v23 }
 0x1bb   :  { %v938_v44 = vcombine.low %v706_v26, %v713_v27  ;;  %v5653_v45 = vcombine.high %v706_v26, %v713_v27  ;;  %v954_v57 = vcombine.low %v722_v28, %v729_v30  ;;  %v5654_v58 = vcombine.high %v722_v28, %v729_v30 }
 0x1bc   :  { %v1214_v59 = vcombine.low %v1190_v53, %v1206_v52  ;;  %v1215_v60 = vcombine.high %v1190_v53, %v1206_v52  ;;  %v1230_v61 = vcombine.low %v1197_v54, %v1213_v34  ;;  %v1231_v63 = vcombine.high %v1197_v54, %v1213_v34 }
 0x1bd   :  { %v6656_v1 = vrot.slane %v938_v44, %v6579_v62  ;;  %v6659_v2 = vrot.slane %v5653_v45, %v6579_v62  ;;  %v1114_v3 = vcombine.low %v6510_v37, %v1091_v36  ;;  %v1115_v4 = vcombine.high %v6510_v37, %v1091_v36 }
 0x1be   :  { %v1097_v0 = vpop.permute.xlu0 %1096  ;;  %v1085_v6 = vpop.permute.xlu1 %1084  ;;  %v1222_v7 = vrot.slane %v1214_v59, %v6583_v5  ;;  %v1229_v8 = vrot.slane %v1215_v60, %v6583_v5  ;;  %v6666_v9 = vrot.slane %v1230_v61, %v6583_v5  ;;  %v6669_v10 = vrot.slane %v1231_v63, %v6583_v5 }
 0x1bf   :  { %v851_v12 = vcombine.high %v6624_v24, %v6627_v25  ;;  %v6676_v13 = vrot.slane %v954_v57, %v6579_v62  ;;  %v6679_v37 = vrot.slane %v5654_v58, %v6579_v62  ;;  %v6682_v14 = vrot.slane %v834_v55, %v6583_v5 }
 0x1c0   :  { %v1454_v15 = vcombine.low %v1222_v7, %v1229_v8  ;;  %v5659_v16 = vcombine.high %v1222_v7, %v1229_v8  ;;  %v1470_v18 = vcombine.low %v6666_v9, %v6669_v10  ;;  %v1122_v20 = vrot.slane %v1114_v3, %v6579_v62 }
 0x1c1   :  { %v1129_v31 = vrot.slane %v1115_v4, %v6579_v62  ;;  %v1130_v21 = vcombine.low %v6615_v17, %v1103_v38  ;;  %v1131_v26 = vcombine.high %v6615_v17, %v1103_v38  ;;  %v6691_v27 = vrot.slane %v850_v56, %v6583_v5 }
 0x1c2   :  { %v1083_v19 = vpop.permute.xlu0 %1082  ;;  %v970_v28 = vcombine.low %v6656_v1, %v6659_v2  ;;  %v1318_v30 = vcombine.low %v6516_v39, %v1097_v0  ;;  %v1319_v32 = vcombine.high %v6516_v39, %v1097_v0  ;;  %v986_v36 = vcombine.low %v6676_v13, %v6679_v37  ;;  %v1109_v38 = vpop.permute.xlu1 %1108 }
 0x1c3   :  { %v1138_v44 = vrot.slane %v1130_v21, %v6579_v62  ;;  %v1145_v17 = vrot.slane %v1131_v26, %v6579_v62  ;;  %v6704_v45 = vrot.slane %v1454_v15, %v6579_v62  ;;  %v6707_v52 = vrot.slane %v5659_v16, %v6579_v62 }
 0x1c4   :  { %v6710_v34 = vrot.slane %v1470_v18, %v6579_v62  ;;  %v5660_v39 = vcombine.high %v6666_v9, %v6669_v10  ;;  %v1326_v58 = vrot.slane %v1318_v30, %v6579_v62  ;;  %v1333_v59 = vrot.slane %v1319_v32, %v6579_v62 }
 0x1c5   :  { %v1146_v53 = vcombine.low %v1122_v20, %v1138_v44  ;;  %v1147_v54 = vcombine.high %v1122_v20, %v1138_v44  ;;  %v1162_v55 = vcombine.low %v1129_v31, %v1145_v17  ;;  %v1163_v56 = vcombine.high %v1129_v31, %v1145_v17 }
 0x1c6   :  { %v1107_v57 = vpop.permute.xlu0 %1106  ;;  %v1334_v60 = vcombine.low %v1085_v6, %v1109_v38  ;;  %v1335_v61 = vcombine.high %v1085_v6, %v1109_v38 }
 0x1c7   :  { %v1154_v63 = vrot.slane %v1146_v53, %v6583_v5  ;;  %v1161_v0 = vrot.slane %v1147_v54, %v6583_v5  ;;  %v1170_v3 = vrot.slane %v1162_v55, %v6583_v5  ;;  %v1177_v4 = vrot.slane %v1163_v56, %v6583_v5 }
 0x1c8   :  { %v1342_v7 = vrot.slane %v1334_v60, %v6579_v62  ;;  %v1349_v8 = vrot.slane %v1335_v61, %v6579_v62  ;;  %v1266_v9 = vcombine.low %v1083_v19, %v1107_v57  ;;  %v1267_v10 = vcombine.high %v1083_v19, %v1107_v57  ;;  %v1095_v19 = vpop.permute.xlu1 %1094 }
 0x1c9   :  { %v1386_v15 = vcombine.low %v1154_v63, %v1161_v0  ;;  %v5657_v16 = vcombine.high %v1154_v63, %v1161_v0  ;;  %v1402_v18 = vcombine.low %v1170_v3, %v1177_v4  ;;  %v5658_v20 = vcombine.high %v1170_v3, %v1177_v4 }
 0x1ca   :  { %v1350_v31 = vcombine.low %v1326_v58, %v1342_v7  ;;  %v1351_v6 = vcombine.high %v1326_v58, %v1342_v7  ;;  %v1366_v21 = vcombine.low %v1333_v59, %v1349_v8  ;;  %v1367_v26 = vcombine.high %v1333_v59, %v1349_v8  ;;  %v513_v56 = vpop.permute.xlu0 %512 }
 0x1cb   :  { %v6723_v30 = vrot.slane %v1386_v15, %v6579_v62  ;;  %v6726_v32 = vrot.slane %v5657_v16, %v6579_v62  ;;  %v6729_v44 = vrot.slane %v1402_v18, %v6579_v62  ;;  %v6732_v17 = vrot.slane %v5658_v20, %v6579_v62 }
 0x1cc   :  { %v1358_v38 = vrot.slane %v1350_v31, %v6583_v5  ;;  %v1365_v53 = vrot.slane %v1351_v6, %v6583_v5  ;;  %v1374_v54 = vrot.slane %v1366_v21, %v6583_v5  ;;  %v1381_v55 = vrot.slane %v1367_v26, %v6583_v5  ;;  %v525_v31 = vpop.permute.xlu1 %524 }
 0x1cd   :  { %v6739_v57 = vrot.slane %v5660_v39, %v6579_v62  ;;  %v1486_v58 = vcombine.low %v6704_v45, %v6707_v52  ;;  %v1274_v59 = vrot.slane %v1266_v9, %v6579_v62  ;;  %v1281_v60 = vrot.slane %v1267_v10, %v6579_v62 }
 0x1ce   :  { %v1590_v61 = vcombine.low %v1358_v38, %v1365_v53  ;;  %v5663_v63 = vcombine.high %v1358_v38, %v1365_v53  ;;  %v1606_v0 = vcombine.low %v1374_v54, %v1381_v55  ;;  %v5664_v3 = vcombine.high %v1374_v54, %v1381_v55 }
 0x1cf   :  { %v1250_v4 = vcombine.low %v6526_v41, %v1095_v19  ;;  %v1251_v7 = vcombine.high %v6526_v41, %v1095_v19  ;;  %v734_v8 = vcombine.low %v6500_v35, %v513_v56  ;;  %v735_v39 = vcombine.high %v6500_v35, %v513_v56 }
 0x1d0   :  { %v1418_v15 = vcombine.low %v6723_v30, %v6726_v32  ;;  %v1434_v9 = vcombine.low %v6729_v44, %v6732_v17  ;;  %v6754_v10 = vrot.slane %v1590_v61, %v6579_v62  ;;  %v6757_v16 = vrot.slane %v5663_v63, %v6579_v62 }
 0x1d1   :  { %v1502_v18 = vcombine.low %v6710_v34, %v6739_v57  ;;  %v6762_v41 = vrot.slane %v1606_v0, %v6579_v62  ;;  %v1258_v35 = vrot.slane %v1250_v4, %v6579_v62  ;;  %v1265_v20 = vrot.slane %v1251_v7, %v6579_v62 }
 0x1d2   :  { %v6767_v6 = vrot.slane %v5664_v3, %v6579_v62  ;;  %v1622_v21 = vcombine.low %v6754_v10, %v6757_v16  ;;  %v742_v26 = vrot.slane %v734_v8, %v6579_v62  ;;  %v749_v19 = vrot.slane %v735_v39, %v6579_v62 }
 0x1d3   :  { %v1282_v38 = vcombine.low %v1258_v35, %v1274_v59  ;;  %v1283_v53 = vcombine.high %v1258_v35, %v1274_v59  ;;  %v1298_v54 = vcombine.low %v1265_v20, %v1281_v60  ;;  %v1299_v55 = vcombine.high %v1265_v20, %v1281_v60 }
 0x1d4   :  { %v750_v56 = vcombine.low %v6599_v43, %v525_v31  ;;  %v751_v61 = vcombine.high %v6599_v43, %v525_v31  ;;  %v6776_v63 = vrot.slane %v1418_v15, %v6583_v5  ;;  %v6779_v0 = vrot.slane %v1434_v9, %v6583_v5 }
 0x1d5   :  { %v1290_v3 = vrot.slane %v1282_v38, %v6583_v5  ;;  %v1297_v4 = vrot.slane %v1283_v53, %v6583_v5  ;;  %v1306_v7 = vrot.slane %v1298_v54, %v6583_v5  ;;  %v1313_v59 = vrot.slane %v1299_v55, %v6583_v5 }
 0x1d6   :  { %v758_v60 = vrot.slane %v750_v56, %v6579_v62  ;;  %v765_v8 = vrot.slane %v751_v61, %v6579_v62  ;;  %v1450_v43 = vcombine.low %v6776_v63, %v6779_v0  ;;  %v866_v39 = vcombine.low %v6682_v14, %v6691_v27 }
 0x1d7   :  { %v1522_v15 = vcombine.low %v1290_v3, %v1297_v4  ;;  %v5661_v9 = vcombine.high %v1290_v3, %v1297_v4  ;;  %v1538_v35 = vcombine.low %v1306_v7, %v1313_v59  ;;  %v5662_v20 = vcombine.high %v1306_v7, %v1313_v59 }
 0x1d8   :  { %v766_v31 = vcombine.low %v742_v26, %v758_v60  ;;  %v767_v38 = vcombine.high %v742_v26, %v758_v60  ;;  %v782_v53 = vcombine.low %v749_v19, %v765_v8  ;;  %v783_v54 = vcombine.high %v749_v19, %v765_v8  ;;  %5873 = vmatpush3.xpose.msk.msra.mxu1 %vm2242_vm2, %v1450_v43 }
 0x1d9   :  { %v6793_v55 = vrot.slane %v1522_v15, %v6579_v62  ;;  %v6796_v56 = vrot.slane %v5661_v9, %v6579_v62  ;;  %v6799_v61 = vrot.slane %v1538_v35, %v6579_v62  ;;  %v6802_v33 = vrot.slane %v5662_v20, %v6579_v62  ;;  %5877 = vmatprep.subr.mxu1 %v6340_v42 }
 0x1da   :  { %v774_v26 = vrot.slane %v766_v31, %v6583_v5  ;;  %v781_v19 = vrot.slane %v767_v38, %v6583_v5  ;;  %v790_v3 = vrot.slane %v782_v53, %v6583_v5  ;;  %v797_v4 = vrot.slane %v783_v54, %v6583_v5 }
 0x1db   :  { %v987_v7 = vcombine.high %v6676_v13, %v6679_v37  ;;  %v1638_v59 = vcombine.low %v6762_v41, %v6767_v6  ;;  %v1554_v60 = vcombine.low %v6793_v55, %v6796_v56  ;;  %v1570_v8 = vcombine.low %v6799_v61, %v6802_v33  ;;  %5875 = vmatmul.mubr.msk.f32.vlgmr.msra.gmra.mxu1 %vm2242_vm2, %v866_v39 }
 0x1dc   :  { %v1006_v43 = vcombine.low %v774_v26, %v781_v19  ;;  %v5655_v15 = vcombine.high %v774_v26, %v781_v19  ;;  %v1022_v9 = vcombine.low %v790_v3, %v797_v4  ;;  %v5656_v35 = vcombine.high %v790_v3, %v797_v4  ;;  %5879 = vmatprep.mubr.msk.f32.mxu1 %vm6341_vm1, %v6340_v42 }
 0x1dd   :  { %v6824_v20 = vrot.slane %v970_v28, %v6583_v5  ;;  %v1494_v31 = vrot.slane %v1486_v58, %v6583_v5  ;;  %v1510_v39 = vrot.slane %v1502_v18, %v6583_v5  ;;  %v6832_v38 = vrot.slane %v1622_v21, %v6583_v5 }
 0x1de   :  { %v6835_v53 = vrot.slane %v1006_v43, %v6579_v62  ;;  %v6838_v54 = vrot.slane %v5655_v15, %v6579_v62  ;;  %v6841_v26 = vrot.slane %v1022_v9, %v6579_v62  ;;  %v6844_v28 = vrot.slane %v5656_v35, %v6579_v62 }
 0x1df   :  { %v1518_v19 = vcombine.low %v1494_v31, %v1510_v39  ;;  %v6847_v58 = vrot.slane %v1638_v59, %v6583_v5  ;;  %v1562_v18 = vrot.slane %v1554_v60, %v6583_v5  ;;  %v1578_v21 = vrot.slane %v1570_v8, %v6583_v5 }
 0x1e0   :  { %v6855_v3 = vrot.slane %v986_v36, %v6583_v5  ;;  %v1487_v4 = vcombine.high %v6704_v45, %v6707_v52  ;;  %v1038_v43 = vcombine.low %v6835_v53, %v6838_v54  ;;  %v1054_v59 = vcombine.low %v6841_v26, %v6844_v28 }
 0x1e1   :  { %v1503_v60 = vcombine.high %v6710_v34, %v6739_v57  ;;  %v1419_v8 = vcombine.high %v6723_v30, %v6726_v32  ;;  %5878 = vmatpush3.xpose.msk.msra.mxu1 %vm2242_vm2, %v1518_v19  ;;  %v1654_v36 = vcombine.low %v6832_v38, %v6847_v58  ;;  %v1586_v15 = vcombine.low %v1562_v18, %v1578_v21 }
 0x1e2   :  { %v1435_v45 = vcombine.high %v6729_v44, %v6732_v17  ;;  %v934_v52 = vcombine.low %v6636_v40, %v6639_v29  ;;  %5887 = vmatprep.subr.mxu1 %v6340_v42  ;;  %v6876_v9 = vrot.slane %v1038_v43, %v6583_v5  ;;  %v6879_v34 = vrot.slane %v1054_v59, %v6583_v5 }
 0x1e3   :  { %v1623_v30 = vcombine.high %v6754_v10, %v6757_v16  ;;  %v1639_v32 = vcombine.high %v6762_v41, %v6767_v6  ;;  %v1555_v44 = vcombine.high %v6793_v55, %v6796_v56  ;;  %v1571_v17 = vcombine.high %v6799_v61, %v6802_v33  ;;  %5883 = vmatpush3.xpose.msk.msra.mxu0 %vm2242_vm2, %v1586_v15 }
 0x1e4   :  { %v1039_v57 = vcombine.high %v6835_v53, %v6838_v54  ;;  %5880 = vmatmul.mubr.msk.f32.vlgmr.msra.gmra.mxu1 %vm2242_vm2, %v934_v52  ;;  %v1002_v35 = vcombine.low %v6824_v20, %v6855_v3  ;;  %5892 = vmatprep.subr.mxu0 %v6340_v42  ;;  %v1070_v10 = vcombine.low %v6876_v9, %v6879_v34 }
 0x1e5   :  { %v1055_v16 = vcombine.high %v6841_v26, %v6844_v28  ;;  %5888 = vmatpush3.xpose.msk.msra.mxu1 %vm2242_vm2, %v1654_v36  ;;  %5889 = vmatprep.mubr.msk.f32.mxu1 %vm6341_vm1, %v6340_v42  ;;  %v1451_v33 = vcombine.high %v6776_v63, %v6779_v0  ;;  %v1519_v41 = vcombine.high %v1494_v31, %v1510_v39  ;;  %v1675_v31 = vpop.permute.xlu0 %1674 }
 0x1e6   :  { %5885 = vmatmul.mubr.msk.f32.vlgmr.msra.gmra.mxu0 %vm2242_vm2, %v1002_v35  ;;  %5897 = vmatprep.subr.mxu1 %v6340_v42  ;;  %v867_v6 = vcombine.high %v6682_v14, %v6691_v27  ;;  %v935_v55 = vcombine.high %v6636_v40, %v6639_v29  ;;  %v1587_v56 = vcombine.high %v1562_v18, %v1578_v21  ;;  %v1663_v27 = vpop.permute.xlu1 %1662 }
 0x1e7   :  { %5893 = vmatpush3.xpose.msk.msra.mxu0 %vm2242_vm2, %v1451_v33  ;;  %5894 = vmatprep.mubr.msk.f32.mxu0 %vm6341_vm1, %v6340_v42  ;;  %v1655_v63 = vcombine.high %v6832_v38, %v6847_v58  ;;  %v6917_v0 = vrot.slane %v1419_v8, %v6583_v5  ;;  %v6920_v61 = vrot.slane %v1435_v45, %v6583_v5 }
 0x1e8   :  { %5890 = vmatmul.mubr.msk.f32.vlgmr.msra.gmra.mxu1 %vm2242_vm2, %v1070_v10  ;;  %5902 = vmatprep.subr.mxu0 %v6340_v42  ;;  %v6925_v40 = vrot.slane %v1487_v4, %v6583_v5  ;;  %v6928_v29 = vrot.slane %v1503_v60, %v6583_v5  ;;  %v6934_v14 = vrot.slane %v835_v11, %v6583_v5 }
 0x1e9   :  { %5898 = vmatpush3.xpose.msk.msra.mxu1 %vm2242_vm2, %v1519_v41  ;;  %5899 = vmatprep.mubr.msk.f32.mxu1 %vm6341_vm1, %v6340_v42  ;;  %v6943_v39 = vrot.slane %v851_v12, %v6583_v5  ;;  %v6946_v38 = vrot.slane %v1555_v44, %v6583_v5  ;;  %v6949_v22 = vrot.slane %v1571_v17, %v6583_v5  ;;  %v1677_v18 = vpop.permute.xlu0 %1676 }
 0x1ea   :  { %5895 = vmatmul.mubr.msk.f32.vlgmr.msra.gmra.mxu0 %vm2242_vm2, %v867_v6  ;;  %5907 = vmatprep.subr.mxu1 %v6340_v42  ;;  %v1003_v23 = vcombine.high %v6824_v20, %v6855_v3  ;;  %v6956_v11 = vrot.slane %v1623_v30, %v6583_v5  ;;  %v6959_v24 = vrot.slane %v1639_v32, %v6583_v5  ;;  %v1687_v19 = vpop.permute.xlu1 %1686 }
 0x1eb   :  { %5903 = vmatpush3.xpose.msk.msra.mxu0 %vm2242_vm2, %v1587_v56  ;;  %5904 = vmatprep.mubr.msk.f32.mxu0 %vm6341_vm1, %v6340_v42  ;;  %v1071_v25 = vcombine.high %v6876_v9, %v6879_v34  ;;  %v1452_v12 = vcombine.low %v6917_v0, %v6920_v61  ;;  %v936_v20 = vcombine.low %v6642_v48, %v6645_v49 }
 0x1ec   :  { %5900 = vmatmul.mubr.msk.f32.vlgmr.msra.gmra.mxu1 %vm2242_vm2, %v935_v55  ;;  %5912 = vmatprep.subr.mxu0 %v6340_v42  ;;  %v1520_v53 = vcombine.low %v6925_v40, %v6928_v29  ;;  %v7646_v54 = vcombine.high %v6656_v1, %v6659_v2  ;;  %v6984_v28 = vrot.slane %v987_v7, %v6583_v5 }
 0x1ed   :  { %5908 = vmatpush3.xpose.msk.msra.mxu1 %vm2242_vm2, %v1655_v63  ;;  %5909 = vmatprep.mubr.msk.f32.mxu1 %vm6341_vm1, %v6340_v42  ;;  %v868_v58 = vcombine.low %v6934_v14, %v6943_v39  ;;  %v1588_v1 = vcombine.low %v6946_v38, %v6949_v22  ;;  %v6994_v2 = vrot.slane %v1039_v57, %v6583_v5 }
 0x1ee   :  { %v6978_v26 = vrot.slane %v7646_v54, %v6583_v5  ;;  %5905 = vmatmul.mubr.msk.f32.vlgmr.msra.gmra.mxu0 %vm2242_vm2, %v1003_v23  ;;  %5917 = vmatprep.subr.mxu1 %v6340_v42  ;;  %v1656_v13 = vcombine.low %v6956_v11, %v6959_v24  ;;  %v7001_v37 = vrot.slane %v1055_v16, %v6583_v5  ;;  %v1665_v60 = vpop.permute.xlu1 %1664 }
 0x1ef   :  { %v1714_v7 = vcombine.low %v1663_v27, %v1687_v19  ;;  %5913 = vmatpush3.xpose.msk.msra.mxu0 %vm2242_vm2, %v1452_v12  ;;  %5914 = vmatprep.mubr.msk.f32.mxu0 %vm6341_vm1, %v6340_v42  ;;  %v1715_v21 = vcombine.high %v1663_v27, %v1687_v19  ;;  %v1698_v3 = vcombine.low %v6549_v46, %v1675_v31 }
 0x1f0   :  { %v1699_v4 = vcombine.high %v6549_v46, %v1675_v31  ;;  %5910 = vmatmul.mubr.msk.f32.vlgmr.msra.gmra.mxu1 %vm2242_vm2, %v1071_v25  ;;  %5922 = vmatprep.subr.mxu0 %v6340_v42  ;;  %v1004_v43 = vcombine.low %v6978_v26, %v6984_v28  ;;  %v1766_v8 = vcombine.low %v6555_v47, %v1677_v18 }
 0x1f1   :  { %v1722_v59 = vrot.slane %v1714_v7, %v6579_v62  ;;  %5918 = vmatpush3.xpose.msk.msra.mxu1 %vm2242_vm2, %v1520_v53  ;;  %5919 = vmatprep.mubr.msk.f32.mxu1 %vm6341_vm1, %v6340_v42  ;;  %v1729_v36 = vrot.slane %v1715_v21, %v6579_v62  ;;  %v1706_v46 = vrot.slane %v1698_v3, %v6579_v62 }
 0x1f2   :  { %v1713_v15 = vrot.slane %v1699_v4, %v6579_v62  ;;  %5915 = vmatmul.mubr.msk.f32.vlgmr.msra.gmra.mxu0 %vm2242_vm2, %v868_v58  ;;  %5927 = vmatprep.subr.mxu1 %v6340_v42  ;;  %v1072_v45 = vcombine.low %v6994_v2, %v7001_v37  ;;  %v1453_v52 = vcombine.high %v6917_v0, %v6920_v61  ;;  %v1689_v35 = vpop.permute.xlu1 %1688 }
 0x1f3   :  { %v1767_v9 = vcombine.high %v6555_v47, %v1677_v18  ;;  %5923 = vmatpush3.xpose.msk.msra.mxu0 %vm2242_vm2, %v1588_v1  ;;  %5924 = vmatprep.mubr.msk.f32.mxu0 %vm6341_vm1, %v6340_v42  ;;  %v1730_v34 = vcombine.low %v1706_v46, %v1722_v59  ;;  %v1731_v30 = vcombine.high %v1706_v46, %v1722_v59 }
 0x1f4   :  { %v1746_v32 = vcombine.low %v1713_v15, %v1729_v36  ;;  %5920 = vmatmul.mubr.msk.f32.vlgmr.msra.gmra.mxu1 %vm2242_vm2, %v936_v20  ;;  %5932 = vmatprep.subr.mxu0 %v6340_v42  ;;  %v1521_v44 = vcombine.high %v6925_v40, %v6928_v29  ;;  %v1747_v17 = vcombine.high %v1713_v15, %v1729_v36 }
 0x1f5   :  { %v1774_v57 = vrot.slane %v1766_v8, %v6579_v62  ;;  %5928 = vmatpush3.xpose.msk.msra.mxu1 %vm2242_vm2, %v1656_v13  ;;  %5929 = vmatprep.mubr.msk.f32.mxu1 %vm6341_vm1, %v6340_v42  ;;  %v1738_v47 = vrot.slane %v1730_v34, %v6583_v5  ;;  %v1745_v10 = vrot.slane %v1731_v30, %v6583_v5 }
 0x1f6   :  { %v1754_v16 = vrot.slane %v1746_v32, %v6583_v5  ;;  %5925 = vmatmul.mubr.msk.f32.vlgmr.msra.gmra.mxu0 %vm2242_vm2, %v1004_v43  ;;  %5937 = vmatprep.subr.mxu1 %v6340_v42  ;;  %v1761_v33 = vrot.slane %v1747_v17, %v6583_v5  ;;  %v1782_v41 = vcombine.low %v1665_v60, %v1689_v35 }
 0x1f7   :  { %v1783_v6 = vcombine.high %v1665_v60, %v1689_v35  ;;  %5933 = vmatpush3.xpose.msk.msra.mxu0 %vm2242_vm2, %v1453_v52  ;;  %5934 = vmatprep.mubr.msk.f32.mxu0 %vm6341_vm1, %v6340_v42  ;;  %v869_v55 = vcombine.high %v6934_v14, %v6943_v39  ;;  %v937_v56 = vcombine.high %v6642_v48, %v6645_v49 }
 0x1f8   :  { %v1781_v63 = vrot.slane %v1767_v9, %v6579_v62  ;;  %5930 = vmatmul.mubr.msk.f32.vlgmr.msra.gmra.mxu1 %vm2242_vm2, %v1072_v45  ;;  %5942 = vmatprep.subr.mxu0 %v6340_v42  ;;  %v1589_v0 = vcombine.high %v6946_v38, %v6949_v22  ;;  %v1657_v61 = vcombine.high %v6956_v11, %v6959_v24 }
 0x1f9   :  { %v1790_v40 = vrot.slane %v1782_v41, %v6579_v62  ;;  %5938 = vmatpush3.xpose.msk.msra.mxu1 %vm2242_vm2, %v1521_v44  ;;  %5939 = vmatprep.mubr.msk.f32.mxu1 %vm6341_vm1, %v6340_v42  ;;  %v1970_v48 = vcombine.low %v1738_v47, %v1745_v10  ;;  %v5665_v49 = vcombine.high %v1738_v47, %v1745_v10  ;;  %v3459_v41 = vld [vmem:[#allocation8] sm:$0x3] }
 0x1fa   :  { %v1797_v29 = vrot.slane %v1783_v6, %v6579_v62  ;;  %5935 = vmatmul.mubr.msk.f32.vlgmr.msra.gmra.mxu0 %vm2242_vm2, %v869_v55  ;;  %5947 = vmatprep.subr.mxu1 %v6340_v42  ;;  %v1986_v14 = vcombine.low %v1754_v16, %v1761_v33  ;;  %v5666_v27 = vcombine.high %v1754_v16, %v1761_v33  ;;  %v6344_v6 = vmov 0  }
 0x1fb   :  { %v1798_v31 = vcombine.low %v1774_v57, %v1790_v40  ;;  %5943 = vmatpush3.xpose.msk.msra.mxu0 %vm2242_vm2, %v1589_v0  ;;  %5944 = vmatprep.mubr.msk.f32.mxu0 %vm6341_vm1, %v6340_v42  ;;  %v1799_v39 = vcombine.high %v1774_v57, %v1790_v40  ;;  %v1005_v23 = vcombine.high %v6978_v26, %v6984_v28  ;;  %v3461_v0 = vld [vmem:[#allocation8 + $0x4] sm:$0x3]  ;;  %v3462_v40 = vld [vmem:[#allocation8 + $0x6] sm:$0x3] }
 0x1fc   :  { %v1814_v38 = vcombine.low %v1781_v63, %v1797_v29  ;;  %v1815_v22 = vcombine.high %v1781_v63, %v1797_v29  ;;  %5940 = vmatmul.mubr.msk.f32.vlgmr.msra.gmra.mxu1 %vm2242_vm2, %v937_v56  ;;  %v1073_v11 = vcombine.high %v6994_v2, %v7001_v37  ;;  %v1977_v53 = vrot.slane %v1970_v48, %v6579_v62  ;;  %v3460_v63 = vld [vmem:[#allocation8 + $0x2] sm:$0x3] }
 0x1fd   :  { %v1806_v24 = vrot.slane %v1798_v31, %v6583_v5  ;;  %5948 = vmatpush3.xpose.msk.msra.mxu1 %vm2242_vm2, %v1657_v61  ;;  %5949 = vmatprep.mubr.msk.f32.mxu1 %vm6341_vm1, %v6340_v42  ;;  %v1813_v25 = vrot.slane %v1799_v39, %v6583_v5  ;;  %v1985_v54 = vrot.slane %v5665_v49, %v6579_v62 }
 0x1fe   :  { %v1822_v12 = vrot.slane %v1814_v38, %v6583_v5  ;;  %v1829_v20 = vrot.slane %v1815_v22, %v6583_v5  ;;  %5945 = vmatmul.mubr.msk.f32.vlgmr.msra.gmra.mxu0 %vm2242_vm2, %v1005_v23  ;;  %v1993_v26 = vrot.slane %v1986_v14, %v6579_v62  ;;  %v2001_v28 = vrot.slane %v5666_v27, %v6579_v62 }
 0x1ff   :  { %v2038_v19 = vcombine.low %v1806_v24, %v1813_v25  ;;  %v5667_v58 = vcombine.high %v1806_v24, %v1813_v25  ;;  %5952 = vmatprep.subr.mxu0 %v6340_v42  ;;  %5957 = vmatprep.subr.mxu1 %v6340_v42  ;;  %v2002_v21 = vcombine.low %v1977_v53, %v1985_v54 }
 0x200   :  { %v2054_v1 = vcombine.low %v1822_v12, %v1829_v20  ;;  %v5668_v2 = vcombine.high %v1822_v12, %v1829_v20  ;;  %5950 = vmatmul.mubr.msk.f32.vlgmr.msra.gmra.mxu1 %vm2242_vm2, %v1073_v11  ;;  %5954 = vmatprep.mubr.msk.f32.mxu0 %vm6341_vm1, %v6340_v42  ;;  %v2018_v3 = vcombine.low %v1993_v26, %v2001_v28 }
 0x201   :  { %v2045_v18 = vrot.slane %v2038_v19, %v6579_v62  ;;  %v2053_v13 = vrot.slane %v5667_v58, %v6579_v62  ;;  %5959 = vmatprep.mubr.msk.f32.mxu1 %vm6341_vm1, %v6340_v42  ;;  %v7097_v59 = vrot.slane %v2002_v21, %v6583_v5  ;;  %v2003_v45 = vcombine.high %v1977_v53, %v1985_v54 }
 0x202   :  { %v2061_v37 = vrot.slane %v2054_v1, %v6579_v62  ;;  %v2069_v7 = vrot.slane %v5668_v2, %v6579_v62  ;;  %v7100_v60 = vrot.slane %v2018_v3, %v6583_v5  ;;  %v2019_v52 = vcombine.high %v1993_v26, %v2001_v28 }
 0x203   :  { %v2070_v4 = vcombine.low %v2045_v18, %v2053_v13  ;;  %v2071_v9 = vcombine.high %v2045_v18, %v2053_v13  ;;  %v7115_v30 = vrot.slane %v2003_v45, %v6583_v5  ;;  %vm3463_vm3 = vnez %v3459_v41 }
 0x204   :  { %v2086_v43 = vcombine.low %v2061_v37, %v2069_v7  ;;  %v2034_v46 = vcombine.low %v7097_v59, %v7100_v60  ;;  %v2087_v34 = vcombine.high %v2061_v37, %v2069_v7  ;;  %v7118_v32 = vrot.slane %v2019_v52, %v6583_v5 }
 0x205   :  { %v7103_v8 = vrot.slane %v2070_v4, %v6583_v5  ;;  %v7121_v44 = vrot.slane %v2071_v9, %v6583_v5  ;;  %v2035_v57 = vcombine.high %v7097_v59, %v7100_v60  ;;  %v3467_v55 = vsel %vm3463_vm3, 16843009, %v6344_v6 }
 0x206   :  { %v7106_v36 = vrot.slane %v2086_v43, %v6583_v5  ;;  %5953 = vmatpush3.msra.mxu0 %v2034_v46  ;;  %v7124_v17 = vrot.slane %v2087_v34, %v6583_v5  ;;  %v2036_v47 = vcombine.low %v7115_v30, %v7118_v32  ;;  %v2037_v10 = vcombine.high %v7115_v30, %v7118_v32 }
 0x207   :  { %5962 = vmatprep.subr.mxu0 %v6340_v42  ;;  %v3471_v56 = vunpack.c.0.s8 %v3467_v55  ;;  %vm3464_vm4 = vnez %v3460_v63  ;;  %vm3465_vm6 = vnez %v3461_v0  ;;  %vm3466_vm7 = vnez %v3462_v40 }
 0x208   :  { %v2102_v15 = vcombine.low %v7103_v8, %v7106_v36  ;;  %v2103_v35 = vcombine.high %v7103_v8, %v7106_v36  ;;  %v2104_v16 = vcombine.low %v7121_v44, %v7124_v17  ;;  %v2105_v33 = vcombine.high %v7121_v44, %v7124_v17 }
 0x209   :  { %vm7138_vm5 = vcmp.ne.s32.totalorder %v3471_v56, 0  ;;  %v3468_v49 = vsel %vm3464_vm4, 16843009, %v6344_v6  ;;  %v3469_v31 = vsel %vm3465_vm6, 16843009, %v6344_v6 }
 0x20a   :  { %5958 = vmatpush3.msra.mxu1 %v2102_v15  ;;  %v3472_v39 = vunpack.c.0.s8 %v3468_v49  ;;  %v3470_v38 = vsel %vm3466_vm7, 16843009, %v6344_v6  ;;  %v3473_v22 = vunpack.c.0.s8 %v3469_v31 }
 0x20b   :  { %5967 = vmatprep.subr.mxu1 %v6340_v42  ;;  %v3474_v11 = vunpack.c.0.s8 %v3470_v38 }
 0x20c   :  { %vm7148_vm8 = vcmp.ne.s32.totalorder %v3472_v39, 0  ;;  %vm7152_vm9 = vcmp.ne.s32.totalorder %v3473_v22, 0 }
 0x20d   :  { %vm7162_vm10 = vcmp.ne.s32.totalorder %v3474_v11, 0 }
 0x29b   :  { %v2315_v48 = vpop.f32.mrf.mxu1 }
 0x29c   :  { %v7144_v29 = vsel %vm7138_vm5, -10000.0, %v2315_v48 }
 0x29d   :  { %v5876_v14 = vpop.f32.mrf.mxu1  ;;  %v3503_v27 = vsel %vm2242_vm2, %v7144_v29, -inf }
 0x29e   :  { %3504 = vmax.xlane.f32.xlu0 %v3503_v27 }
 0x2a4   :  { %v2391_v24 = vpop.f32.mrf.mxu1 }
 0x2a5   :  { %v7158_v12 = vsel %vm7148_vm8, -10000.0, %v2391_v24 }
 0x2a6   :  { %v5881_v20 = vpop.f32.mrf.mxu1  ;;  %v3506_v53 = vsel %vm2242_vm2, %v7158_v12, -inf  ;;  %v2467_v54 = vpop.f32.mrf.mxu0 }
 0x2a7   :  { %3507 = vmax.xlane.f32.xlu1 %v3506_v53  ;;  %v7168_v28 = vsel %vm7152_vm9, -10000.0, %v2467_v54 }
 0x2a8   :  { %v2543_v19 = vpop.f32.mrf.mxu1  ;;  %v5886_v58 = vpop.f32.mrf.mxu0  ;;  %v3509_v1 = vsel %vm2242_vm2, %v7168_v28, -inf }
 0x2a9   :  { %v7174_v2 = vsel %vm7162_vm10, -10000.0, %v2543_v19  ;;  %3510 = vmax.xlane.f32.xlu0 %v3509_v1 }
 0x2aa   :  { %v5891_v18 = vpop.f32.mrf.mxu1  ;;  %v2619_v13 = vpop.f32.mrf.mxu0  ;;  %v3512_v4 = vsel %vm2242_vm2, %v7174_v2, -inf }
 0x2ab   :  { %v7178_v37 = vsel %vm7138_vm5, -10000.0, %v2619_v13 }
 0x2ac   :  { %v2695_v7 = vpop.f32.mrf.mxu1  ;;  %v5896_v21 = vpop.f32.mrf.mxu0  ;;  %v3515_v3 = vsel %vm2242_vm2, %v7178_v37, -inf }
 0x2ad   :  { %v7186_v43 = vsel %vm7148_vm8, -10000.0, %v2695_v7  ;;  %3516 = vmax.xlane.f32.xlu1 %v3515_v3  ;;  %3513 = vmax.xlane.f32.xlu0 %v3512_v4 }
 0x2ae   :  { %v5901_v46 = vpop.f32.mrf.mxu1  ;;  %v2771_v15 = vpop.f32.mrf.mxu0  ;;  %v3518_v9 = vsel %vm2242_vm2, %v7186_v43, -inf }
 0x2af   :  { %v7192_v34 = vsel %vm7152_vm9, -10000.0, %v2771_v15 }
 0x2b0   :  { %v2847_v45 = vpop.f32.mrf.mxu1  ;;  %v5906_v52 = vpop.f32.mrf.mxu0  ;;  %v3521_v63 = vsel %vm2242_vm2, %v7192_v34, -inf }
 0x2b1   :  { %3519 = vmax.xlane.f32.xlu0 %v3518_v9  ;;  %v7230_v4 = vsel %vm7162_vm10, -10000.0, %v2847_v45 }
 0x2b2   :  { %v5911_v41 = vpop.f32.mrf.mxu1  ;;  %v2923_v6 = vpop.f32.mrf.mxu0  ;;  %v3524_v46 = vsel %vm2242_vm2, %v7230_v4, -inf }
 0x2b3   :  { %v7198_v0 = vsel %vm7138_vm5, -10000.0, %v2923_v6  ;;  %v1667_v41 = vpop.permute.xlu0 %1666  ;;  %v1679_v6 = vpop.permute.xlu1 %1678 }
 0x2b4   :  { %v2999_v55 = vpop.f32.mrf.mxu1  ;;  %v5916_v56 = vpop.f32.mrf.mxu0  ;;  %v3527_v27 = vsel %vm2242_vm2, %v7198_v0, -inf }
 0x2b5   :  { %3522 = vmax.xlane.f32.xlu0 %v3521_v63  ;;  %v7236_v15 = vsel %vm7148_vm8, -10000.0, %v2999_v55  ;;  %v1834_v63 = vcombine.low %v6565_v50, %v1679_v6 }
 0x2b6   :  { %v5921_v40 = vpop.f32.mrf.mxu1  ;;  %v3075_v48 = vpop.f32.mrf.mxu0  ;;  %v3530_v52 = vsel %vm2242_vm2, %v7236_v15, -inf }
 0x2b7   :  { %v7204_v31 = vsel %vm7152_vm9, -10000.0, %v3075_v48  ;;  %v1691_v55 = vpop.permute.xlu0 %1690  ;;  %v1835_v40 = vcombine.high %v6565_v50, %v1679_v6 }
 0x2b8   :  { %v3151_v49 = vpop.f32.mrf.mxu1  ;;  %v5926_v14 = vpop.f32.mrf.mxu0  ;;  %v3533_v24 = vsel %vm2242_vm2, %v7204_v31, -inf  ;;  %v1850_v56 = vcombine.low %v1667_v41, %v1691_v55  ;;  %v1851_v61 = vcombine.high %v1667_v41, %v1691_v55 }
 0x2b9   :  { %3528 = vmax.xlane.f32.xlu0 %v3527_v27  ;;  %v7210_v20 = vsel %vm7162_vm10, -10000.0, %v3151_v49  ;;  %v1842_v49 = vrot.slane %v1834_v63, %v6579_v62  ;;  %v1849_v14 = vrot.slane %v1835_v40, %v6579_v62 }
 0x2ba   :  { %v5931_v39 = vpop.f32.mrf.mxu1  ;;  %v3227_v38 = vpop.f32.mrf.mxu0  ;;  %v3536_v1 = vsel %vm2242_vm2, %v7210_v20, -inf  ;;  %v1858_v48 = vrot.slane %v1850_v56, %v6579_v62  ;;  %v1865_v25 = vrot.slane %v1851_v61, %v6579_v62 }
 0x2bb   :  { %v7242_v9 = vsel %vm7138_vm5, -10000.0, %v3227_v38 }
 0x2bc   :  { %v3303_v22 = vpop.f32.mrf.mxu1  ;;  %v5936_v11 = vpop.f32.mrf.mxu0  ;;  %v3539_v26 = vsel %vm2242_vm2, %v7242_v9, -inf  ;;  %v1866_v27 = vcombine.low %v1842_v49, %v1858_v48  ;;  %v1867_v39 = vcombine.high %v1842_v49, %v1858_v48  ;;  %v1882_v38 = vcombine.low %v1849_v14, %v1865_v25 }
 0x2bd   :  { %3534 = vmax.xlane.f32.xlu0 %v3533_v24  ;;  %v7218_v18 = vsel %vm7148_vm8, -10000.0, %v3303_v22  ;;  %v1883_v22 = vcombine.high %v1849_v14, %v1865_v25  ;;  %v1681_v11 = vpop.permute.xlu0 %1680 }
 0x2be   :  { %v5941_v53 = vpop.f32.mrf.mxu1  ;;  %1692 = vrot.lane.b32.xlu1 %v6571_v51, %s6339_s25  ;;  %v3379_v54 = vpop.f32.mrf.mxu0  ;;  %v3542_v7 = vsel %vm2242_vm2, %v7218_v18, -inf  ;;  %v1874_v24 = vrot.slane %v1866_v27, %v6583_v5 }
 0x2bf   :  { %v7248_v45 = vsel %vm7152_vm9, -10000.0, %v3379_v54  ;;  %v1881_v53 = vrot.slane %v1867_v39, %v6583_v5  ;;  %v1890_v54 = vrot.slane %v1882_v38, %v6583_v5  ;;  %v1897_v50 = vrot.slane %v1883_v22, %v6583_v5 }
 0x2c0   :  { %v3455_v19 = vpop.f32.mrf.mxu1  ;;  %v5946_v58 = vpop.f32.mrf.mxu0  ;;  %v3545_v23 = vsel %vm2242_vm2, %v7248_v45, -inf  ;;  %v1902_v22 = vcombine.low %v6571_v51, %v1681_v11 }
 0x2c1   :  { %3537 = vmax.xlane.f32.xlu0 %v3536_v1  ;;  %v7224_v21 = vsel %vm7162_vm10, -10000.0, %v3455_v19  ;;  %v2106_v1 = vcombine.low %v1874_v24, %v1881_v53 }
 0x2c2   :  { %v5951_v13 = vpop.f32.mrf.mxu1  ;;  %v3548_v3 = vsel %vm2242_vm2, %v7224_v21, -inf }
 0x2c3   :  { %v5669_v13 = vcombine.high %v1874_v24, %v1881_v53 }
 0x2c5   :  { %3543 = vmax.xlane.f32.xlu0 %v3542_v7  ;;  %v2122_v7 = vcombine.low %v1890_v54, %v1897_v50 }
 0x2c7   :  { %v7270_v41 = vrot.slane %v2122_v7, %v6579_v62 }
 0x2c9   :  { %3549 = vmax.xlane.f32.xlu0 %v3548_v3  ;;  %v5670_v3 = vcombine.high %v1890_v54, %v1897_v50 }
 0x2cb   :  { %v7273_v6 = vrot.slane %v5670_v3, %v6579_v62 }
 0x2cd   :  { %v2154_v61 = vcombine.low %v7270_v41, %v7273_v6 }
 0x2cf   :  { %v7285_v14 = vrot.slane %v2154_v61, %v6583_v5 }
 0x2e2   :  { %3525 = vmax.xlane.f32.xlu1 %v3524_v46 }
 0x2e6   :  { %3531 = vmax.xlane.f32.xlu1 %v3530_v52  ;;  %v1669_v52 = vpop.permute.xlu1 %1668 }
 0x2ea   :  { %3540 = vmax.xlane.f32.xlu1 %v3539_v26  ;;  %v7264_v26 = vrot.slane %v2106_v1, %v6579_v62 }
 0x2ee   :  { %3546 = vmax.xlane.f32.xlu1 %v3545_v23  ;;  %v7267_v23 = vrot.slane %v5669_v13, %v6579_v62 }
 0x2f0   :  { %v2138_v56 = vcombine.low %v7264_v26, %v7267_v23 }
 0x2f2   :  { %v7282_v49 = vrot.slane %v2138_v56, %v6583_v5 }
 0x2f4   :  { %v2170_v50 = vcombine.low %v7282_v49, %v7285_v14  ;;  %v2171_v60 = vcombine.high %v7282_v49, %v7285_v14  ;;  %v2139_v14 = vcombine.high %v7264_v26, %v7267_v23 }
 0x327   :  { %v3505_v19 = vpop.xlane.xlu0 %3504 }
 0x328   :  { %v3551_v58 = vsub.f32 %v7144_v29, %v3505_v19 }
 0x32a   :  { %v3567_v46 = vmul.f32 1.442695, %v3551_v58 }
 0x32c   :  { %6069 = vpow2.f32 %v3567_v46 }
 0x330   :  { %v3508_v29 = vpop.xlane.xlu1 %3507 }
 0x331   :  { %v3552_v55 = vsub.f32 %v7158_v12, %v3508_v29 }
 0x332   :  { %v3511_v63 = vpop.xlane.xlu0 %3510 }
 0x333   :  { %v3569_v40 = vmul.f32 1.442695, %v3552_v55  ;;  %v3553_v48 = vsub.f32 %v7168_v28, %v3511_v63  ;;  %v1903_v28 = vcombine.high %v6571_v51, %v1681_v11  ;;  %v1910_v51 = vrot.slane %v1902_v22, %v6579_v62 }
 0x335   :  { %6071 = vpow2.f32 %v3569_v40  ;;  %v3571_v25 = vmul.f32 1.442695, %v3553_v48  ;;  %v1917_v11 = vrot.slane %v1903_v28, %v6579_v62 }
 0x336   :  { %v3514_v27 = vpop.xlane.xlu0 %3513  ;;  %v3517_v12 = vpop.xlane.xlu1 %3516 }
 0x337   :  { %6073 = vpow2.f32 %v3571_v25  ;;  %v3554_v39 = vsub.f32 %v7174_v2, %v3514_v27  ;;  %v3555_v38 = vsub.f32 %v7178_v37, %v3517_v12 }
 0x339   :  { %v6070_v24 = vpop.eup %6069  ;;  %v3573_v53 = vmul.f32 1.442695, %v3554_v39  ;;  %v3575_v54 = vmul.f32 1.442695, %v3555_v38 }
 0x33a   :  { %5955 = vmatmul.mubr.msk.f32.vlgmr.msra.gmra.mxu0 %vm2242_vm2, %v6070_v24  ;;  %v3520_v19 = vpop.xlane.xlu0 %3519  ;;  %v3599_v58 = vsel %vm2242_vm2, %v6070_v24, 0.0  ;;  %v1693_v1 = vpop.permute.xlu1 %1692 }
 0x33b   :  { %6075 = vpow2.f32 %v3573_v53  ;;  %5963 = vmatpush3.msra.mxu0 %v2170_v50  ;;  %v3556_v2 = vsub.f32 %v7186_v43, %v3520_v19  ;;  %3600 = vadd.xlane.f32.xlu1 %v3599_v58  ;;  %v1918_v37 = vcombine.low %v1669_v52, %v1693_v1  ;;  %v1919_v13 = vcombine.high %v1669_v52, %v1693_v1 }
 0x33c   :  { %6077 = vpow2.f32 %v3575_v54  ;;  %5964 = vmatprep.mubr.msk.f32.mxu0 %vm6341_vm1, %v6340_v42  ;;  %5972 = vmatprep.subr.mxu0 %v6340_v42 }
 0x33d   :  { %v3577_v7 = vmul.f32 1.442695, %v3556_v2  ;;  %v1926_v3 = vrot.slane %v1918_v37, %v6579_v62  ;;  %v1933_v46 = vrot.slane %v1919_v13, %v6579_v62 }
 0x33e   :  { %v3523_v29 = vpop.xlane.xlu0 %3522 }
 0x33f   :  { %6079 = vpow2.f32 %v3577_v7  ;;  %v1934_v43 = vcombine.low %v1910_v51, %v1926_v3  ;;  %v1935_v55 = vcombine.high %v1910_v51, %v1926_v3  ;;  %v1950_v52 = vcombine.low %v1917_v11, %v1933_v46 }
 0x340   :  { %v1951_v56 = vcombine.high %v1917_v11, %v1933_v46  ;;  %v3557_v61 = vsub.f32 %v7192_v34, %v3523_v29 }
 0x341   :  { %v1942_v63 = vrot.slane %v1934_v43, %v6583_v5  ;;  %v1949_v40 = vrot.slane %v1935_v55, %v6583_v5  ;;  %v1958_v48 = vrot.slane %v1950_v52, %v6583_v5  ;;  %v2155_v52 = vcombine.high %v7270_v41, %v7273_v6 }
 0x342   :  { %v6072_v25 = vpop.eup %6071  ;;  %v1965_v27 = vrot.slane %v1951_v56, %v6583_v5  ;;  %v3579_v12 = vmul.f32 1.442695, %v3557_v61  ;;  %v3529_v39 = vpop.xlane.xlu0 %3528  ;;  %v7361_v61 = vrot.slane %v2139_v14, %v6583_v5 }
 0x343   :  { %v2174_v38 = vcombine.low %v1942_v63, %v1949_v40  ;;  %v5671_v22 = vcombine.high %v1942_v63, %v1949_v40  ;;  %5960 = vmatmul.mubr.msk.f32.vlgmr.msra.gmra.mxu1 %vm2242_vm2, %v6072_v25  ;;  %v3602_v24 = vsel %vm2242_vm2, %v6072_v25, 0.0  ;;  %v3559_v28 = vsub.f32 %v7198_v0, %v3529_v39 }
 0x344   :  { %v6074_v34 = vpop.eup %6073  ;;  %v2190_v53 = vcombine.low %v1958_v48, %v1965_v27  ;;  %v5672_v54 = vcombine.high %v1958_v48, %v1965_v27  ;;  %6081 = vpow2.f32 %v3579_v12  ;;  %3603 = vadd.xlane.f32.xlu1 %v3602_v24  ;;  %5969 = vmatprep.mubr.msk.f32.mxu1 %vm6341_vm1, %v6340_v42  ;;  %v7364_v26 = vrot.slane %v2155_v52, %v6583_v5 }
 0x345   :  { %v7314_v50 = vrot.slane %v2174_v38, %v6579_v62  ;;  %v7317_v19 = vrot.slane %v5671_v22, %v6579_v62  ;;  %v3583_v58 = vmul.f32 1.442695, %v3559_v28  ;;  %5965 = vmatmul.mubr.msk.f32.vlgmr.msra.gmra.mxu0 %vm2242_vm2, %v6074_v34  ;;  %v3605_v1 = vsel %vm2242_vm2, %v6074_v34, 0.0 }
 0x346   :  { %v7322_v0 = vrot.slane %v2190_v53, %v6579_v62  ;;  %v7325_v2 = vrot.slane %v5672_v54, %v6579_v62  ;;  %5973 = vmatpush3.msra.mxu0 %v2035_v57  ;;  %v3535_v37 = vpop.xlane.xlu0 %3534  ;;  %5974 = vmatprep.mubr.msk.f32.mxu0 %vm6341_vm1, %v6340_v42  ;;  %v2172_v36 = vcombine.low %v7361_v61, %v7364_v26 }
 0x347   :  { %6083 = vpow2.f32 %v3583_v58  ;;  %v3561_v13 = vsub.f32 %v7204_v31, %v3535_v37  ;;  %5982 = vmatprep.subr.mxu0 %v6340_v42  ;;  %v2206_v51 = vcombine.low %v7314_v50, %v7317_v19 }
 0x348   :  { %v6076_v11 = vpop.eup %6075  ;;  %3606 = vadd.xlane.f32.xlu1 %v3605_v1  ;;  %v2222_v7 = vcombine.low %v7322_v0, %v7325_v2 }
 0x349   :  { %v6078_v3 = vpop.eup %6077  ;;  %v3587_v59 = vmul.f32 1.442695, %v3561_v13  ;;  %v3608_v57 = vsel %vm2242_vm2, %v6076_v11, 0.0  ;;  %v2214_v46 = vrot.slane %v2206_v51, %v6583_v5 }
 0x34a   :  { %5975 = vmatmul.mubr.msk.f32.vlgmr.msra.gmra.mxu0 %vm2242_vm2, %v6078_v3  ;;  %v3611_v31 = vsel %vm2242_vm2, %v6078_v3, 0.0  ;;  %v2230_v29 = vrot.slane %v2222_v7, %v6583_v5  ;;  %v3538_v6 = vpop.xlane.xlu0 %3537 }
 0x34b   :  { %6085 = vpow2.f32 %v3587_v59  ;;  %5983 = vmatpush3.msra.mxu0 %v2171_v60  ;;  %3612 = vadd.xlane.f32.xlu0 %v3611_v31  ;;  %v3562_v25 = vsub.f32 %v7210_v20, %v3538_v6 }
 0x34c   :  { %v6080_v43 = vpop.eup %6079  ;;  %3609 = vadd.xlane.f32.xlu1 %v3608_v57  ;;  %v2238_v55 = vcombine.low %v2214_v46, %v2230_v29  ;;  %5984 = vmatprep.mubr.msk.f32.mxu0 %vm6341_vm1, %v6340_v42  ;;  %v2239_v41 = vcombine.high %v2214_v46, %v2230_v29 }
 0x34d   :  { %v3614_v49 = vsel %vm2242_vm2, %v6080_v43, 0.0  ;;  %5992 = vmatprep.subr.mxu0 %v6340_v42  ;;  %v3589_v30 = vmul.f32 1.442695, %v3562_v25 }
 0x34e   :  { %5968 = vmatpush3.msra.mxu1 %v2238_v55  ;;  %v3544_v27 = vpop.xlane.xlu0 %3543 }
 0x34f   :  { %3615 = vadd.xlane.f32.xlu0 %v3614_v49  ;;  %5970 = vmatmul.mubr.msk.f32.vlgmr.msra.gmra.mxu1 %vm2242_vm2, %v6076_v11  ;;  %v3564_v32 = vsub.f32 %v7218_v18, %v3544_v27  ;;  %v2223_v18 = vcombine.high %v7322_v0, %v7325_v2  ;;  %v2173_v2 = vcombine.high %v7361_v61, %v7364_v26 }
 0x350   :  { %5977 = vmatprep.subr.mxu1 %v6340_v42  ;;  %5979 = vmatprep.mubr.msk.f32.mxu1 %vm6341_vm1, %v6340_v42 }
 0x351   :  { %v6082_v56 = vpop.eup %6081  ;;  %5978 = vmatpush3.msra.mxu1 %v2103_v35  ;;  %v2237_v37 = vrot.slane %v2223_v18, %v6583_v5 }
 0x352   :  { %5985 = vmatmul.mubr.msk.f32.vlgmr.msra.gmra.mxu0 %vm2242_vm2, %v6082_v56  ;;  %5987 = vmatprep.subr.mxu1 %v6340_v42  ;;  %v3617_v23 = vsel %vm2242_vm2, %v6082_v56, 0.0  ;;  %v3550_v24 = vpop.xlane.xlu0 %3549 }
 0x353   :  { %5993 = vmatpush3.msra.mxu0 %v2036_v47  ;;  %3618 = vadd.xlane.f32.xlu0 %v3617_v23  ;;  %v3566_v20 = vsub.f32 %v7224_v21, %v3550_v24 }
 0x354   :  { %v6084_v8 = vpop.eup %6083  ;;  %5980 = vmatmul.mubr.msk.f32.vlgmr.msra.gmra.mxu1 %vm2242_vm2, %v6080_v43  ;;  %5994 = vmatprep.mubr.msk.f32.mxu0 %vm6341_vm1, %v6340_v42 }
 0x355   :  { %5988 = vmatpush3.msra.mxu1 %v2239_v41  ;;  %6002 = vmatprep.subr.mxu0 %v6340_v42  ;;  %v3623_v35 = vsel %vm2242_vm2, %v6084_v8, 0.0  ;;  %v3597_v58 = vmul.f32 1.442695, %v3566_v20 }
 0x356   :  { %5995 = vmatmul.mubr.msk.f32.vlgmr.msra.gmra.mxu0 %vm2242_vm2, %v6084_v8  ;;  %3624 = vadd.xlane.f32.xlu1 %v3623_v35 }
 0x357   :  { %6003 = vmatpush3.msra.mxu0 %v2172_v36  ;;  %6004 = vmatprep.mubr.msk.f32.mxu0 %vm6341_vm1, %v6340_v42 }
 0x358   :  { %v7382_v47 = vpop.eup %6085  ;;  %6012 = vmatprep.subr.mxu0 %v6340_v42  ;;  %5989 = vmatprep.mubr.msk.f32.mxu1 %vm6341_vm1, %v6340_v42 }
 0x359   :  { %5997 = vmatprep.subr.mxu1 %v6340_v42  ;;  %v3629_v51 = vsel %vm2242_vm2, %v7382_v47, 0.0 }
 0x35a   :  { %6005 = vmatmul.mubr.msk.f32.vlgmr.msra.gmra.mxu0 %vm2242_vm2, %v7382_v47 }
 0x35b   :  { %6013 = vmatpush3.msra.mxu0 %v2037_v10  ;;  %6014 = vmatprep.mubr.msk.f32.mxu0 %vm6341_vm1, %v6340_v42 }
 0x35c   :  { %6022 = vmatprep.subr.mxu0 %v6340_v42 }
 0x36b   :  { %v3526_v63 = vpop.xlane.xlu1 %3525 }
 0x36c   :  { %v3558_v40 = vsub.f32 %v7230_v4, %v3526_v63  ;;  %v3593_v4 = vmul.f32 1.442695, %v3564_v32 }
 0x36e   :  { %v3581_v48 = vmul.f32 1.442695, %v3558_v40 }
 0x36f   :  { %v3532_v12 = vpop.xlane.xlu1 %3531 }
 0x370   :  { %6087 = vpow2.f32 %v3581_v48  ;;  %v3560_v39 = vsub.f32 %v7236_v15, %v3532_v12  ;;  %v2207_v15 = vcombine.high %v7314_v50, %v7317_v19 }
 0x372   :  { %v3585_v38 = vmul.f32 1.442695, %v3560_v39  ;;  %v2221_v1 = vrot.slane %v2207_v15, %v6583_v5 }
 0x373   :  { %v3541_v10 = vpop.xlane.xlu1 %3540 }
 0x374   :  { %6089 = vpow2.f32 %v3585_v38  ;;  %v3563_v22 = vsub.f32 %v7242_v9, %v3541_v10  ;;  %v2240_v50 = vcombine.low %v2221_v1, %v2237_v37  ;;  %v2241_v3 = vcombine.high %v2221_v1, %v2237_v37 }
 0x375   :  { %6091 = vpow2.f32 %v3589_v30 }
 0x376   :  { %v3591_v28 = vmul.f32 1.442695, %v3563_v22 }
 0x377   :  { %v3547_v34 = vpop.xlane.xlu1 %3546 }
 0x378   :  { %6093 = vpow2.f32 %v3591_v28  ;;  %v3565_v53 = vsub.f32 %v7248_v45, %v3547_v34 }
 0x379   :  { %6095 = vpow2.f32 %v3593_v4 }
 0x37a   :  { %v3595_v54 = vmul.f32 1.442695, %v3565_v53 }
 0x37c   :  { %6097 = vpow2.f32 %v3595_v54 }
 0x37d   :  { %v6088_v9 = vpop.eup %6087  ;;  %6099 = vpow2.f32 %v3597_v58 }
 0x37e   :  { %5990 = vmatmul.mubr.msk.f32.vlgmr.msra.gmra.mxu1 %vm2242_vm2, %v6088_v9  ;;  %v3620_v21 = vsel %vm2242_vm2, %v6088_v9, 0.0 }
 0x37f   :  { %5998 = vmatpush3.msra.mxu1 %v2104_v16  ;;  %3621 = vadd.xlane.f32.xlu0 %v3620_v21 }
 0x380   :  { %5999 = vmatprep.mubr.msk.f32.mxu1 %vm6341_vm1, %v6340_v42  ;;  %6007 = vmatprep.subr.mxu1 %v6340_v42 }
 0x381   :  { %v6090_v45 = vpop.eup %6089 }
 0x382   :  { %6000 = vmatmul.mubr.msk.f32.vlgmr.msra.gmra.mxu1 %vm2242_vm2, %v6090_v45  ;;  %v3626_v19 = vsel %vm2242_vm2, %v6090_v45, 0.0  ;;  %v6092_v0 = vpop.eup %6091 }
 0x383   :  { %6008 = vmatpush3.msra.mxu1 %v2240_v50  ;;  %3627 = vadd.xlane.f32.xlu1 %v3626_v19  ;;  %v3632_v44 = vsel %vm2242_vm2, %v6092_v0, 0.0 }
 0x384   :  { %6009 = vmatprep.mubr.msk.f32.mxu1 %vm6341_vm1, %v6340_v42  ;;  %6017 = vmatprep.subr.mxu1 %v6340_v42 }
 0x385   :  { %v6094_v16 = vpop.eup %6093 }
 0x386   :  { %6010 = vmatmul.mubr.msk.f32.vlgmr.msra.gmra.mxu1 %vm2242_vm2, %v6092_v0  ;;  %6015 = vmatmul.mubr.msk.f32.vlgmr.msra.gmra.mxu0 %vm2242_vm2, %v6094_v16  ;;  %v3635_v13 = vsel %vm2242_vm2, %v6094_v16, 0.0  ;;  %v6096_v11 = vpop.eup %6095 }
 0x387   :  { %6018 = vmatpush3.msra.mxu1 %v2105_v33  ;;  %6023 = vmatpush3.msra.mxu0 %v2173_v2  ;;  %v3638_v17 = vsel %vm2242_vm2, %v6096_v11, 0.0 }
 0x388   :  { %3630 = vadd.xlane.f32.xlu1 %v3629_v51  ;;  %3636 = vadd.xlane.f32.xlu0 %v3635_v13 }
 0x389   :  { %v6098_v7 = vpop.eup %6097  ;;  %6019 = vmatprep.mubr.msk.f32.mxu1 %vm6341_vm1, %v6340_v42  ;;  %6024 = vmatprep.mubr.msk.f32.mxu0 %vm6341_vm1, %v6340_v42 }
 0x38a   :  { %6027 = vmatprep.subr.mxu1 %v6340_v42  ;;  %6020 = vmatmul.mubr.msk.f32.vlgmr.msra.gmra.mxu1 %vm2242_vm2, %v6096_v11  ;;  %v6100_v33 = vpop.eup %6099  ;;  %v3641_v59 = vsel %vm2242_vm2, %v6098_v7, 0.0 }
 0x38b   :  { %6025 = vmatmul.mubr.msk.f32.vlgmr.msra.gmra.mxu0 %vm2242_vm2, %v6098_v7  ;;  %6028 = vmatpush3.msra.mxu1 %v2241_v3  ;;  %v3644_v60 = vsel %vm2242_vm2, %v6100_v33, 0.0 }
 0x38c   :  { %3633 = vadd.xlane.f32.xlu1 %v3632_v44  ;;  %3639 = vadd.xlane.f32.xlu0 %v3638_v17 }
 0x38d   :  { %6029 = vmatprep.mubr.msk.f32.mxu1 %vm6341_vm1, %v6340_v42 }
 0x38e   :  { %6030 = vmatmul.mubr.msk.f32.vlgmr.msra.gmra.mxu1 %vm2242_vm2, %v6100_v33 }
 0x390   :  { %3642 = vadd.xlane.f32.xlu0 %v3641_v59 }
 0x394   :  { %3645 = vadd.xlane.f32.xlu0 %v3644_v60 }
 0x3c4   :  { %v3601_v31 = vpop.xlane.xlu1 %3600 }
 0x3c5   :  { %6101 = vrcp.f32 %v3601_v31 }
 0x3cd   :  { %v3604_v14 = vpop.xlane.xlu1 %3603 }
 0x3ce   :  { %6103 = vrcp.f32 %v3604_v14 }
 0x3d1   :  { %v3607_v61 = vpop.xlane.xlu1 %3606 }
 0x3d2   :  { %6105 = vrcp.f32 %v3607_v61  ;;  %v6102_v28 = vpop.eup %6101 }
 0x3d3   :  { %v4831_v21 = vmul.f32 %v6102_v28, %v3601_v31 }
 0x3d4   :  { %v3613_v42 = vpop.xlane.xlu0 %3612 }
 0x3d5   :  { %v3610_v36 = vpop.xlane.xlu1 %3609  ;;  %6107 = vrcp.f32 %v3613_v42  ;;  %v4847_v44 = vsub.f32 2.0, %v4831_v21 }
 0x3d8   :  { %v3616_v26 = vpop.xlane.xlu0 %3615 }
 0x3db   :  { %v6104_v4 = vpop.eup %6103 }
 0x3dc   :  { %v3619_v6 = vpop.xlane.xlu0 %3618  ;;  %v4832_v45 = vmul.f32 %v6104_v4, %v3604_v14 }
 0x3de   :  { %v4848_v17 = vsub.f32 2.0, %v4832_v45 }
 0x3df   :  { %v3625_v40 = vpop.xlane.xlu1 %3624  ;;  %v6106_v34 = vpop.eup %6105 }
 0x3e0   :  { %v4833_v19 = vmul.f32 %v6106_v34, %v3607_v61 }
 0x3e2   :  { %v6108_v53 = vpop.eup %6107  ;;  %v4849_v60 = vsub.f32 2.0, %v4833_v19 }
 0x3e3   :  { %v4835_v0 = vmul.f32 %v6108_v53, %v3613_v42 }
 0x3fa   :  { %v7446_v57 = vpop.f32.mrf.mxu0 }
 0x3fc   :  { %v5956_v46 = vpop.f32.mrf.mxu0 }
 0x3fd   :  { %v4851_v46 = vsub.f32 2.0, %v4835_v0 }
 0x403   :  { %v7448_v29 = vpop.f32.mrf.mxu1 }
 0x405   :  { %v5961_v43 = vpop.f32.mrf.mxu1  ;;  %v7450_v55 = vpop.f32.mrf.mxu0 }
 0x407   :  { %v5966_v49 = vpop.f32.mrf.mxu0 }
 0x408   :  { %v7462_v25 = vpop.xlane.xlu0 %3621 }
 0x40a   :  { %v7452_v52 = vpop.f32.mrf.mxu0 }
 0x40c   :  { %v5976_v56 = vpop.f32.mrf.mxu0  ;;  %v3628_v12 = vpop.xlane.xlu1 %3627 }
 0x40f   :  { %v7454_v23 = vpop.f32.mrf.mxu1 }
 0x411   :  { %v5971_v41 = vpop.f32.mrf.mxu1  ;;  %v3637_v38 = vpop.xlane.xlu0 %3636 }
 0x412   :  { %v7456_v8 = vpop.f32.mrf.mxu0  ;;  %v3631_v32 = vpop.xlane.xlu1 %3630 }
 0x413   :  { %6109 = vrcp.f32 %v3631_v32 }
 0x414   :  { %v7458_v35 = vpop.f32.mrf.mxu1  ;;  %v5986_v47 = vpop.f32.mrf.mxu0  ;;  %6111 = vrcp.f32 %v3610_v36 }
 0x415   :  { %v7466_v10 = vpop.xlane.xlu0 %3639  ;;  %6113 = vrcp.f32 %v3625_v40  ;;  %v4864_v47 = vmul.f32 %v6104_v4, %v4848_v17 }
 0x416   :  { %v5981_v63 = vpop.f32.mrf.mxu1  ;;  %v7460_v48 = vpop.f32.mrf.mxu0  ;;  %6115 = vrcp.f32 %v3616_v26 }
 0x417   :  { %6117 = vrcp.f32 %v3619_v6  ;;  %v3634_v24 = vpop.xlane.xlu1 %3633 }
 0x418   :  { %v5996_v27 = vpop.f32.mrf.mxu0  ;;  %6119 = vrcp.f32 %v3628_v12 }
 0x419   :  { %v7468_v22 = vpop.xlane.xlu0 %3642  ;;  %6121 = vrcp.f32 %v3637_v38 }
 0x41a   :  { %v7464_v39 = vpop.f32.mrf.mxu0  ;;  %6123 = vrcp.f32 %v3634_v24 }
 0x41b   :  { %6125 = vrcp.f32 %v7462_v25 }
 0x41c   :  { %v6006_v30 = vpop.f32.mrf.mxu0  ;;  %6127 = vrcp.f32 %v7466_v10 }
 0x41d   :  { %v3646_v20 = vpop.xlane.xlu0 %3645  ;;  %6129 = vrcp.f32 %v7468_v22  ;;  %v4867_v30 = vmul.f32 %v6108_v53, %v4851_v46 }
 0x41e   :  { %6131 = vrcp.f32 %v3646_v20 }
 0x420   :  { %v6110_v15 = vpop.eup %6109 }
 0x421   :  { %v6112_v18 = vpop.eup %6111  ;;  %v4841_v9 = vmul.f32 %v6110_v15, %v3631_v32 }
 0x422   :  { %v6114_v54 = vpop.eup %6113  ;;  %v4834_v16 = vmul.f32 %v6112_v18, %v3610_v36  ;;  %v4863_v36 = vmul.f32 %v6102_v28, %v4847_v44 }
 0x423   :  { %v6116_v58 = vpop.eup %6115  ;;  %v4839_v50 = vmul.f32 %v6114_v54, %v3625_v40  ;;  %v4857_v51 = vsub.f32 2.0, %v4841_v9 }
 0x424   :  { %v6118_v1 = vpop.eup %6117  ;;  %v4836_v2 = vmul.f32 %v6116_v58, %v3616_v26  ;;  %v4850_v43 = vsub.f32 2.0, %v4834_v16  ;;  %v4879_v28 = vmul.f32 %v4863_v36, %v7446_v57 }
 0x425   :  { %v6120_v37 = vpop.eup %6119  ;;  %v4837_v13 = vmul.f32 %v6118_v1, %v3619_v6  ;;  %v4855_v33 = vsub.f32 2.0, %v4839_v50  ;;  %v4873_v14 = vmul.f32 %v6110_v15, %v4857_v51 }
 0x426   :  { %v6122_v11 = vpop.eup %6121  ;;  %v4840_v7 = vmul.f32 %v6120_v37, %v3628_v12  ;;  %v4852_v49 = vsub.f32 2.0, %v4836_v2  ;;  %v4865_v12 = vmul.f32 %v6106_v34, %v4849_v60  ;;  %v4866_v32 = vmul.f32 %v6112_v18, %v4850_v43 }
 0x427   :  { %v6124_v3 = vpop.eup %6123  ;;  %v4853_v31 = vsub.f32 2.0, %v4837_v13  ;;  %v4843_v42 = vmul.f32 %v6122_v11, %v3637_v38  ;;  %v4871_v63 = vmul.f32 %v6114_v54, %v4855_v33  ;;  %v4889_v38 = vmul.f32 %v4873_v14, %v7464_v39 }
 0x428   :  { %v6126_v59 = vpop.eup %6125  ;;  %v4856_v61 = vsub.f32 2.0, %v4840_v7  ;;  %v4842_v41 = vmul.f32 %v6124_v3, %v3634_v24  ;;  %v4868_v9 = vmul.f32 %v6116_v58, %v4852_v49  ;;  %v4881_v54 = vmul.f32 %v4865_v12, %v7450_v55 }
 0x429   :  { %v6128_v56 = vpop.eup %6127  ;;  %v4838_v6 = vmul.f32 %v6126_v59, %v7462_v25  ;;  %v4869_v21 = vmul.f32 %v6118_v1, %v4853_v31  ;;  %v4887_v15 = vmul.f32 %v4871_v63, %v7460_v48  ;;  %v4859_v4 = vsub.f32 2.0, %v4843_v42 }
 0x42a   :  { %v6130_v26 = vpop.eup %6129  ;;  %v4844_v45 = vmul.f32 %v6128_v56, %v7466_v10  ;;  %v4858_v50 = vsub.f32 2.0, %v4842_v41  ;;  %v4872_v25 = vmul.f32 %v6120_v37, %v4856_v61  ;;  %v4880_v58 = vmul.f32 %v4864_v47, %v7448_v29 }
 0x42b   :  { %v6132_v27 = vpop.eup %6131  ;;  %v4854_v19 = vsub.f32 2.0, %v4838_v6  ;;  %v4845_v34 = vmul.f32 %v6130_v26, %v7468_v22  ;;  %v4883_v10 = vmul.f32 %v4867_v30, %v7452_v52  ;;  %v4882_v48 = vmul.f32 %v4866_v32, %v7454_v23 }
 0x42c   :  { %v4846_v53 = vmul.f32 %v6132_v27, %v3646_v20  ;;  %v4860_v1 = vsub.f32 2.0, %v4844_v45  ;;  %v4895_v0 = vcombine.low %v4879_v28, %v4887_v15  ;;  %v4896_v57 = vcombine.high %v4879_v28, %v4887_v15 }
 0x42d   :  { %v5031_v16 = vcombine.low %v4881_v54, %v4889_v38  ;;  %v4885_v37 = vmul.f32 %v4869_v21, %v7456_v8  ;;  %v4884_v55 = vmul.f32 %v4868_v9, %v7458_v35  ;;  %v4874_v13 = vmul.f32 %v6124_v3, %v4858_v50 }
 0x42e   :  { %v4875_v22 = vmul.f32 %v6122_v11, %v4859_v4  ;;  %v4861_v20 = vsub.f32 2.0, %v4845_v34  ;;  %v5032_v51 = vcombine.high %v4881_v54, %v4889_v38  ;;  %v4862_v7 = vsub.f32 2.0, %v4846_v53 }
 0x42f   :  { %v4870_v29 = vmul.f32 %v6126_v59, %v4854_v19  ;;  %v4903_v46 = vrot.slane %v4895_v0, %v6579_v62  ;;  %v4910_v43 = vrot.slane %v4896_v57, %v6579_v62  ;;  %v5039_v8 = vrot.slane %v5031_v16, %v6579_v62 }
 0x430   :  { %v4876_v3 = vmul.f32 %v6128_v56, %v4860_v1  ;;  %v5046_v59 = vrot.slane %v5032_v51, %v6579_v62  ;;  %v4877_v36 = vmul.f32 %v6130_v26, %v4861_v20  ;;  %v4878_v47 = vmul.f32 %v6132_v27, %v4862_v7 }
 0x43e   :  { %v4227_v40 = vpop.f32.mrf.mxu1 }
 0x43f   :  { %v7489_v42 = vmul.f32 %v4870_v29, %v4227_v40 }
 0x440   :  { %v5991_v24 = vpop.f32.mrf.mxu1 }
 0x442   :  { %v4373_v18 = vpop.f32.mrf.mxu1 }
 0x443   :  { %v4888_v39 = vmul.f32 %v4872_v25, %v4373_v18 }
 0x444   :  { %v6001_v2 = vpop.f32.mrf.mxu1 }
 0x445   :  { %v4963_v17 = vcombine.low %v4880_v58, %v4888_v39  ;;  %v4964_v23 = vcombine.high %v4880_v58, %v4888_v39 }
 0x446   :  { %v4519_v44 = vpop.f32.mrf.mxu1  ;;  %v4592_v52 = vpop.f32.mrf.mxu0 }
 0x447   :  { %v4890_v33 = vmul.f32 %v4874_v13, %v4519_v44  ;;  %v4891_v60 = vmul.f32 %v4875_v22, %v4592_v52  ;;  %v4971_v6 = vrot.slane %v4963_v17, %v6579_v62  ;;  %v4978_v63 = vrot.slane %v4964_v23, %v6579_v62 }
 0x448   :  { %v6011_v49 = vpop.f32.mrf.mxu1  ;;  %v6016_v35 = vpop.f32.mrf.mxu0 }
 0x449   :  { %v5099_v11 = vcombine.low %v4882_v48, %v4890_v33  ;;  %v5100_v31 = vcombine.high %v4882_v48, %v4890_v33  ;;  %v4911_v14 = vcombine.low %v4883_v10, %v4891_v60  ;;  %v4912_v61 = vcombine.high %v4883_v10, %v4891_v60 }
 0x44a   :  { %v4665_v41 = vpop.f32.mrf.mxu1 }
 0x44b   :  { %v4919_v12 = vrot.slane %v4911_v14, %v6579_v62  ;;  %v4926_v30 = vrot.slane %v4912_v61, %v6579_v62  ;;  %v4738_v56 = vpop.f32.mrf.mxu0  ;;  %v7496_v32 = vrot.slane %v5099_v11, %v6579_v62  ;;  %v7499_v9 = vrot.slane %v5100_v31, %v6579_v62 }
 0x44c   :  { %v4892_v40 = vmul.f32 %v4876_v3, %v4665_v41  ;;  %v4893_v21 = vmul.f32 %v4877_v36, %v4738_v56  ;;  %v6021_v45 = vpop.f32.mrf.mxu1 }
 0x44d   :  { %v4927_v26 = vcombine.low %v4903_v46, %v4919_v12  ;;  %v4928_v27 = vcombine.high %v4903_v46, %v4919_v12  ;;  %v4943_v15 = vcombine.low %v4910_v43, %v4926_v30  ;;  %v4944_v38 = vcombine.high %v4910_v43, %v4926_v30  ;;  %v6026_v24 = vpop.f32.mrf.mxu0 }
 0x44e   :  { %v4979_v28 = vcombine.low %v4884_v55, %v4892_v40  ;;  %v4980_v4 = vcombine.high %v4884_v55, %v4892_v40  ;;  %v5047_v50 = vcombine.low %v4885_v37, %v4893_v21  ;;  %v5048_v25 = vcombine.high %v4885_v37, %v4893_v21  ;;  %v4811_v54 = vpop.f32.mrf.mxu1 }
 0x44f   :  { %v4935_v19 = vrot.slane %v4927_v26, %v6583_v5  ;;  %v4942_v34 = vrot.slane %v4928_v27, %v6583_v5  ;;  %v4951_v53 = vrot.slane %v4943_v15, %v6583_v5  ;;  %v4958_v18 = vrot.slane %v4944_v38, %v6583_v5  ;;  %v5504_v26 = vld [vmem:[#allocation14 + $0x18] sm:$0xff]  ;;  %v5503_v27 = vld [vmem:[#allocation14 + $0x10] sm:$0xff] }
 0x450   :  { %v4987_v58 = vrot.slane %v4979_v28, %v6579_v62  ;;  %v4994_v10 = vrot.slane %v4980_v4, %v6579_v62  ;;  %v5055_v48 = vrot.slane %v5047_v50, %v6579_v62  ;;  %v5062_v39 = vrot.slane %v5048_v25, %v6579_v62  ;;  %v6031_v1 = vpop.f32.mrf.mxu1  ;;  %6032 = vmatprep.subr.mxu0 %v5504_v26 }
 0x451   :  { %v5167_v0 = vcombine.low %v4935_v19, %v4942_v34  ;;  %v5721_v57 = vcombine.high %v4935_v19, %v4942_v34  ;;  %v5183_v16 = vcombine.low %v4951_v53, %v4958_v18  ;;  %v5722_v2 = vcombine.high %v4951_v53, %v4958_v18  ;;  %6033 = vmatpush3.msra.mxu0 %v5504_v26 }
 0x452   :  { %v4995_v37 = vcombine.low %v4971_v6, %v4987_v58  ;;  %v4996_v55 = vcombine.high %v4971_v6, %v4987_v58  ;;  %v5011_v13 = vcombine.low %v4978_v63, %v4994_v10  ;;  %v5012_v22 = vcombine.high %v4978_v63, %v4994_v10  ;;  %6034 = vmatprep.subr.mxu0 %v5503_v27 }
 0x453   :  { %v5063_v20 = vcombine.low %v5039_v8, %v5055_v48  ;;  %v5064_v51 = vcombine.high %v5039_v8, %v5055_v48  ;;  %v5079_v7 = vcombine.low %v5046_v59, %v5062_v39  ;;  %v5080_v29 = vcombine.high %v5046_v59, %v5062_v39  ;;  %6035 = vmatpush3.msra.mxu0 %v5503_v27 }
 0x454   :  { %v5003_v44 = vrot.slane %v4995_v37, %v6583_v5  ;;  %v5010_v52 = vrot.slane %v4996_v55, %v6583_v5  ;;  %v5019_v17 = vrot.slane %v5011_v13, %v6583_v5  ;;  %v5026_v23 = vrot.slane %v5012_v22, %v6583_v5 }
 0x455   :  { %v7514_v33 = vrot.slane %v5063_v20, %v6583_v5  ;;  %v7517_v60 = vrot.slane %v5064_v51, %v6583_v5  ;;  %v7520_v46 = vrot.slane %v5079_v7, %v6583_v5  ;;  %v7523_v43 = vrot.slane %v5080_v29, %v6583_v5 }
 0x456   :  { %v4894_v8 = vmul.f32 %v4878_v47, %v4811_v54  ;;  %v5174_v49 = vrot.slane %v5167_v0, %v6579_v62  ;;  %v5182_v35 = vrot.slane %v5721_v57, %v6579_v62  ;;  %v5190_v3 = vrot.slane %v5183_v16, %v6579_v62  ;;  %v5501_v0 = vld [vmem:[#allocation14] sm:$0xff] }
 0x457   :  { %v5198_v11 = vrot.slane %v5722_v2, %v6579_v62  ;;  %v5235_v31 = vcombine.low %v5003_v44, %v5010_v52  ;;  %v5723_v14 = vcombine.high %v5003_v44, %v5010_v52  ;;  %v5251_v61 = vcombine.low %v5019_v17, %v5026_v23 }
 0x458   :  { %v5115_v59 = vcombine.low %v7489_v42, %v4894_v8  ;;  %v5116_v41 = vcombine.high %v7489_v42, %v4894_v8  ;;  %v5200_v36 = vcombine.high %v5174_v49, %v5182_v35  ;;  %v5199_v6 = vcombine.low %v5174_v49, %v5182_v35 }
 0x459   :  { %v5216_v63 = vcombine.high %v5190_v3, %v5198_v11  ;;  %v5215_v12 = vcombine.low %v5190_v3, %v5198_v11  ;;  %v5242_v47 = vrot.slane %v5235_v31, %v6579_v62  ;;  %v5250_v30 = vrot.slane %v5723_v14, %v6579_v62 }
 0x45a   :  { %v5123_v56 = vrot.slane %v5115_v59, %v6579_v62  ;;  %v5130_v40 = vrot.slane %v5116_v41, %v6579_v62  ;;  %v5214_v21 = vrot.slane %v5200_v36, %v6583_v5  ;;  %v7537_v45 = vrot.slane %v5199_v6, %v6583_v5 }
 0x45b   :  { %v5230_v42 = vrot.slane %v5216_v63, %v6583_v5  ;;  %v7541_v15 = vrot.slane %v5215_v12, %v6583_v5  ;;  %v5258_v38 = vrot.slane %v5251_v61, %v6579_v62  ;;  %v5724_v24 = vcombine.high %v5019_v17, %v5026_v23 }
 0x45c   :  { %v5131_v28 = vcombine.low %v7496_v32, %v5123_v56  ;;  %v5132_v4 = vcombine.high %v7496_v32, %v5123_v56  ;;  %v5147_v50 = vcombine.low %v7499_v9, %v5130_v40  ;;  %v5148_v25 = vcombine.high %v7499_v9, %v5130_v40  ;;  %v5502_v9 = vld [vmem:[#allocation14 + $0x8] sm:$0xff] }
 0x45d   :  { %v5234_v54 = vcombine.high %v5214_v21, %v5230_v42  ;;  %v5232_v19 = vcombine.high %v7537_v45, %v7541_v15  ;;  %v5231_v34 = vcombine.low %v7537_v45, %v7541_v15  ;;  %v5233_v53 = vcombine.low %v5214_v21, %v5230_v42  ;;  %6036 = vmatprep.subr.mxu0 %v5502_v9 }
 0x45e   :  { %v5139_v18 = vrot.slane %v5131_v28, %v6583_v5  ;;  %v5146_v58 = vrot.slane %v5132_v4, %v6583_v5  ;;  %v5155_v32 = vrot.slane %v5147_v50, %v6583_v5  ;;  %v5162_v10 = vrot.slane %v5148_v25, %v6583_v5  ;;  %6037 = vmatpush3.msra.mxu0 %v5502_v9 }
 0x45f   :  { %5475 = vrot.lane.b32.xlu0 %v5234_v54, %s6345_s9  ;;  %5443 = vrot.lane.b32.xlu1 %v5232_v19, %s6328_s27  ;;  %v5266_v48 = vrot.slane %v5724_v24, %v6579_v62  ;;  %v5267_v39 = vcombine.low %v5242_v47, %v5250_v30  ;;  %v5268_v1 = vcombine.high %v5242_v47, %v5250_v30 }
 0x460   :  { %v5303_v57 = vcombine.low %v7514_v33, %v7517_v60  ;;  %v5725_v16 = vcombine.high %v7514_v33, %v7517_v60  ;;  %v5319_v2 = vcombine.low %v7520_v46, %v7523_v43  ;;  %v5726_v37 = vcombine.high %v7520_v46, %v7523_v43  ;;  %6038 = vmatprep.subr.mxu0 %v5501_v0 }
 0x461   :  { %v7568_v55 = vrot.slane %v5267_v39, %v6583_v5  ;;  %v5283_v13 = vcombine.low %v5258_v38, %v5266_v48  ;;  %v5282_v22 = vrot.slane %v5268_v1, %v6583_v5  ;;  %v5284_v20 = vcombine.high %v5258_v38, %v5266_v48  ;;  %6039 = vmatpush3.msra.mxu0 %v5501_v0 }
 0x462   :  { %v5310_v51 = vrot.slane %v5303_v57, %v6579_v62  ;;  %v5318_v7 = vrot.slane %v5725_v16, %v6579_v62  ;;  %v5326_v29 = vrot.slane %v5319_v2, %v6579_v62  ;;  %v5334_v44 = vrot.slane %v5726_v37, %v6579_v62 }
 0x463   :  { %5459 = vrot.lane.b32.xlu1 %v5233_v53, %s6346_s30  ;;  %v5291_v52 = vrot.slane %v5283_v13, %v6583_v5  ;;  %v5298_v17 = vrot.slane %v5284_v20, %v6583_v5  ;;  %v5371_v23 = vcombine.low %v5139_v18, %v5146_v58  ;;  %v5727_v33 = vcombine.high %v5139_v18, %v5146_v58 }
 0x464   :  { %v5335_v60 = vcombine.low %v5310_v51, %v5318_v7  ;;  %v5351_v46 = vcombine.low %v5326_v29, %v5334_v44  ;;  %v5336_v43 = vcombine.high %v5310_v51, %v5318_v7  ;;  %v5352_v8 = vcombine.high %v5326_v29, %v5334_v44  ;;  %v5729_v29 = vld [vmem:[%s7644_s11] ss:$0 sm:$0xff]  ;;  %s6293_s11 = scalar_lea.vmem %s5619_s0, 512 }
 0x465   :  { %v5300_v49 = vcombine.high %v7568_v55, %v5291_v52  ;;  %v5299_v35 = vcombine.low %v7568_v55, %v5291_v52  ;;  %v5301_v3 = vcombine.low %v5282_v22, %v5298_v17  ;;  %v5378_v59 = vrot.slane %v5371_v23, %v6579_v62  ;;  %p6294_p12 = scmp.ne.s32.totalorder %s5619_s0, %s6293_s11  ;;  %p6299_p0 = scmp.lt.s32.totalorder %s6293_s11, %s6293_s11 }
 0x466   :  { %v5343_v11 = vrot.slane %v5335_v60, %v6583_v5  ;;  %v5359_v31 = vrot.slane %v5351_v46, %v6583_v5  ;;  %v5350_v14 = vrot.slane %v5336_v43, %v6583_v5  ;;  %v5366_v61 = vrot.slane %v5352_v8, %v6583_v5 }
 0x467   :  { %5445 = vrot.lane.b32.xlu0 %v5300_v49, %s6328_s27  ;;  %5461 = vrot.lane.b32.xlu1 %v5301_v3, %s6346_s30  ;;  %v5386_v41 = vrot.slane %v5727_v33, %v6579_v62  ;;  %v5387_v36 = vcombine.low %v5155_v32, %v5162_v10  ;;  %v5302_v30 = vcombine.high %v5282_v22, %v5298_v17  ;;  %p6300_p1 = por %p6299_p0, %p6298_p13 }
 0x468   :  { %v5368_v6 = vcombine.high %v5343_v11, %v5359_v31  ;;  %v5367_v63 = vcombine.low %v5343_v11, %v5359_v31  ;;  %v5369_v12 = vcombine.low %v5350_v14, %v5366_v61  ;;  %v5370_v47 = vcombine.high %v5350_v14, %v5366_v61 }
 0x469   :  { %v5394_v56 = vrot.slane %v5387_v36, %v6579_v62  ;;  %v5728_v40 = vcombine.high %v5155_v32, %v5162_v10  ;;  %v5403_v21 = vcombine.low %v5378_v59, %v5386_v41  ;;  %v5404_v38 = vcombine.high %v5378_v59, %v5386_v41  ;;  %p6301_p2 = pnand %p6300_p1, %p6294_p12 }
 0x46b   :  { %5447 = vrot.lane.b32.xlu0 %v5368_v6, %s6328_s27  ;;  %5477 = vrot.lane.b32.xlu1 %v5302_v30, %s6345_s9  ;;  %v5402_v26 = vrot.slane %v5728_v40, %v6579_v62  ;;  %v5411_v27 = vrot.slane %v5403_v21, %v6583_v5  ;;  %v5418_v25 = vrot.slane %v5404_v38, %v6583_v5 }
 0x46d   :  { %v5419_v42 = vcombine.low %v5394_v56, %v5402_v26  ;;  %v5420_v24 = vcombine.high %v5394_v56, %v5402_v26 }
 0x46f   :  { %5463 = vrot.lane.b32.xlu0 %v5369_v12, %s6346_s30  ;;  %v5427_v28 = vrot.slane %v5419_v42, %v6583_v5  ;;  %v5434_v54 = vrot.slane %v5420_v24, %v6583_v5 }
 0x471   :  { %v5436_v4 = vcombine.high %v5411_v27, %v5427_v28  ;;  %v5435_v50 = vcombine.low %v5411_v27, %v5427_v28  ;;  %v5437_v62 = vcombine.low %v5418_v25, %v5434_v54  ;;  %v5438_v19 = vcombine.high %v5418_v25, %v5434_v54 }
 0x473   :  { %5479 = vrot.lane.b32.xlu0 %v5370_v47, %s6345_s9  ;;  %5449 = vrot.lane.b32.xlu1 %v5436_v4, %s6328_s27 }
 0x477   :  { %5465 = vrot.lane.b32.xlu1 %v5437_v62, %s6346_s30 }
 0x47b   :  { %5481 = vrot.lane.b32.xlu1 %v5438_v19, %s6345_s9 }
 0x4d1   :  { %v5444_v53 = vpop.permute.xlu1 %5443  ;;  %v5476_v18 = vpop.permute.xlu0 %5475 }
 0x4d2   :  { %v5487_v58 = vsel %vm2242_vm2, %v5231_v34, %v5444_v53 }
 0x4d5   :  { %v5460_v5 = vpop.permute.xlu1 %5459 }
 0x4d6   :  { %v5492_v32 = vsel %vm5491_vm11, %v5487_v58, %v5460_v5 }
 0x4d7   :  { %v5497_v10 = vsel %vm5496_vm12, %v5492_v32, %v5476_v18 }
 0x4d8   :  { %6040 = vmatprep.mubr.msk.f32.mxu0 %vm168_vm0, %v5497_v10 }
 0x4d9   :  { %v5446_v9 = vpop.permute.xlu0 %5445  ;;  %v5462_v48 = vpop.permute.xlu1 %5461 }
 0x4da   :  { %v5488_v39 = vsel %vm2242_vm2, %v5299_v35, %v5446_v9 }
 0x4db   :  { %v5493_v0 = vsel %vm5491_vm11, %v5488_v39, %v5462_v48 }
 0x4dd   :  { %v5448_v1 = vpop.permute.xlu0 %5447  ;;  %v5478_v57 = vpop.permute.xlu1 %5477 }
 0x4de   :  { %v5498_v16 = vsel %vm5496_vm12, %v5493_v0, %v5478_v57  ;;  %v5489_v15 = vsel %vm2242_vm2, %v5367_v63, %v5448_v1 }
 0x4df   :  { %6041 = vmatmul.mubr.msk.f32.vlgmr.msra.gmra.mxu0 %vm168_vm0, %v5498_v16 }
 0x4e1   :  { %v5464_v45 = vpop.permute.xlu0 %5463 }
 0x4e2   :  { %v5494_v34 = vsel %vm5491_vm11, %v5489_v15, %v5464_v45 }
 0x4e5   :  { %v5480_v2 = vpop.permute.xlu0 %5479  ;;  %v5450_v37 = vpop.permute.xlu1 %5449 }
 0x4e6   :  { %v5499_v55 = vsel %vm5496_vm12, %v5494_v34, %v5480_v2  ;;  %v5490_v22 = vsel %vm2242_vm2, %v5435_v50, %v5450_v37 }
 0x4e7   :  { %6043 = vmatprep.mubr.msk.f32.mxu0 %vm168_vm0, %v5499_v55 }
 0x4e9   :  { %v5466_v13 = vpop.permute.xlu1 %5465 }
 0x4ea   :  { %v5495_v20 = vsel %vm5491_vm11, %v5490_v22, %v5466_v13 }
 0x4ed   :  { %v5482_v51 = vpop.permute.xlu1 %5481 }
 0x4ee   :  { %v5500_v7 = vsel %vm5496_vm12, %v5495_v20, %v5482_v51 }
 0x4ef   :  { %6044 = vmatmul.mubr.msk.f32.gmra.mxu0 %vm168_vm0, %v5500_v7 }
 0x59f   :  { %v6042_v44 = vpop.f32.mrf.mxu0 }
 0x5a0   :  { %v5596_v52 = vadd.f32 %v6042_v44, %v5729_v29 }
 0x5a1   :  { %v5590_v17 = vpop.f32.mrf.mxu0 }
 0x5a2   :  { %5610 = vst.msk [vmem:[#allocation16 + $0x8] sm:$0xff] %vm168_vm0, %v5596_v52  ;;  %v5591_v23 = vadd.f32 %v5729_v29, %v5590_v17 }
 0x5a4   :  { %5609 = vst.msk [vmem:[#allocation16] sm:$0xff] %vm168_vm0, %v5591_v23 }
 0x5af   :  { %v6045_v33 = vpop.f32.mrf.mxu0 }
 0x5b0   :  { %v5606_v60 = vadd.f32 %v6045_v33, %v5729_v29 }
 0x5b1   :  { %v5600_v46 = vpop.f32.mrf.mxu0 }
 0x5b2   :  { %5612 = vst.msk [vmem:[#allocation16 + $0x18] sm:$0xff] %vm168_vm0, %v5606_v60  ;;  %v5601_v43 = vadd.f32 %v5729_v29, %v5600_v46 }
 0x5b4   :  { %5611 = vst.msk [vmem:[#allocation16 + $0x10] sm:$0xff] %vm168_vm0, %v5601_v43 }
 0x5b5   :  { %6304 = shalt.err (!%p6301_p2)
}
 0x5b6   :  { %5624 = dma.vmem_to_hbm [thread:$0]  %s5619_s0, 512, %s7645_s12, [#allocation4], %s6327_s26, %s6327_s26, %s6328_s27  }
 0x5b7   :  { %6323 = dma.done.wait [#allocation4], 512  }
 0x5b8   :  { %6324 = vsyncadd [#allocation4], 4294966784 }
 0x5b9   :  { %5628 = vsyncpa [#allocation3], 1 }
 0x5ba   :  { %5629 = vsyncpa [#allocation6], 1 }
 0x5bb   :  { %5630 = vsyncpa [#allocation9], 1 }
 0x5bc   :  { %5631 = vsyncpa [#allocation12], 1 }
 0x5bd   :  { %5632 = vsyncpa [#allocation15], 1 }
 0x5be   :  { %5633 = vsyncpa [#allocation4], 1 }

</bundles_post_ra>
